<compile_context>
chip_gen: v6e
topology: v6e:2x2x1
jax: 0.10.0
libtpu: 0.0.40
codegen_flags: <defaults>
</compile_context>

<pallas_src>
import functools

import jax
import jax.numpy as jnp
from jax.experimental import pallas as pl
from jax.experimental.pallas import tpu as pltpu

EPS = 1e-5  # PyTorch BatchNorm2d default eps
_VMEM_LIMIT = 32 * 1024 * 1024  # safe on v5e/v6e/v7x (v7x physical VMEM = 64 MiB)


def _conv_stats_kernel(x_ref, xt_ref, xb_ref, w_ref, s_ref, t_ref,
                       z_ref, stats_ref, *, fuse_input_norm):
    """One (batch, row-band) tile:
       [optional y = relu(x*s + t)] -> 3x3 conv (pad=1, no bias) -> z
       plus per-tile per-channel sum / sum-of-squares of z.

    x_ref  : (1, TH, W, Cin)  main row band (f32)
    xt_ref : (1, 1,  W, Cin)  row above the band (clamped at boundary)
    xb_ref : (1, 1,  W, Cin)  row below the band (clamped at boundary)
    w_ref  : (9*Cin, Cout)    conv weight, taps folded into K (bf16)
    s_ref  : (1, Cin)         per-channel scale  (used iff fuse_input_norm)
    t_ref  : (1, Cin)         per-channel shift  (used iff fuse_input_norm)
    z_ref  : (1, TH, W, Cout) raw conv output (f32)
    stats  : (1, 1, 2, Cout)  [sum(z), sum(z*z)] over the tile's pixels
    """
    i = pl.program_id(1)
    nblk = pl.num_programs(1)
    _, TH, W, Cin = x_ref.shape
    Cout = z_ref.shape[3]

    xm = x_ref[0]     # (TH, W, Cin) f32
    xt = xt_ref[0]    # (1,  W, Cin) f32
    xb = xb_ref[0]    # (1,  W, Cin) f32

    if fuse_input_norm:
        # BN+ReLU of the previous conv block, fused on the input path (f32 VPU).
        s = s_ref[...]
        t = t_ref[...]
        xm = jnp.maximum(xm * s + t, 0.0)
        xt = jnp.maximum(xt * s + t, 0.0)
        xb = jnp.maximum(xb * s + t, 0.0)

    # Halo rows that fall outside the image are the conv's zero padding
    # (zero AFTER the fused normalize: padding is zero in y-space).
    xt = xt * (i > 0).astype(jnp.float32)
    xb = xb * (i < nblk - 1).astype(jnp.float32)

    # Build the (TH+2, W+2, Cin) zero-padded tile; cast once to bf16 for the MXU.
    xh = jnp.concatenate([xt, xm, xb], axis=0).astype(jnp.bfloat16)   # (TH+2, W, Cin)
    zc = jnp.zeros((TH + 2, 1, Cin), jnp.bfloat16)
    xp = jnp.concatenate([zc, xh, zc], axis=1)                        # (TH+2, W+2, Cin)

    # im2col once: fold the 9 taps into the contraction dim (K = 9*Cin),
    # then a single MXU matmul with f32 accumulation.
    cols = []
    for ky in range(3):
        for kx in range(3):
            cols.append(xp[ky:ky + TH, kx:kx + W, :].reshape(TH * W, Cin))
    patch = jnp.concatenate(cols, axis=1)                             # (TH*W, 9*Cin) bf16

    z = jnp.dot(patch, w_ref[...], preferred_element_type=jnp.float32)  # (TH*W, Cout) f32

    z_ref[...] = z.reshape(1, TH, W, Cout)
    # One-pass BN statistics: per-channel sum and sum-of-squares for this tile.
    stats_ref[...] = jnp.stack(
        [jnp.sum(z, axis=0), jnp.sum(z * z, axis=0)]).reshape(1, 1, 2, Cout)


def _norm_relu_kernel(z_ref, s_ref, t_ref, o_ref):
    """Final fused BatchNorm (as scale/shift) + ReLU:  o = max(z*s + t, 0)."""
    o_ref[...] = jnp.maximum(z_ref[...] * s_ref[...] + t_ref[...], 0.0)


def _conv3x3_stats(x, w_flat, scale, shift, cout, *, block_rows, fuse_input_norm):
    """Tiled conv3x3 (+optional fused input normalize) returning (z, per-tile stats)."""
    N, H, W, Cin = x.shape
    TH = block_rows
    nblk = H // TH

    kernel = functools.partial(_conv_stats_kernel, fuse_input_norm=fuse_input_norm)

    return pl.pallas_call(
        kernel,
        grid=(N, nblk),
        in_specs=[
            # main TH-row band
            pl.BlockSpec((1, TH, W, Cin), lambda n, i: (n, i, 0, 0)),
            # 1-row halo above / below (block size 1 -> block index == row index),
            # clamped at the image boundary and zeroed in-kernel.
            pl.BlockSpec((1, 1, W, Cin),
                         lambda n, i: (n, jnp.maximum(i * TH - 1, 0), 0, 0)),
            pl.BlockSpec((1, 1, W, Cin),
                         lambda n, i: (n, jnp.minimum(i * TH + TH, H - 1), 0, 0)),
            # weight + per-channel scale/shift: constant index -> resident in VMEM
            pl.BlockSpec((9 * Cin, cout), lambda n, i: (0, 0)),
            pl.BlockSpec((1, Cin), lambda n, i: (0, 0)),
            pl.BlockSpec((1, Cin), lambda n, i: (0, 0)),
        ],
        out_specs=(
            pl.BlockSpec((1, TH, W, cout), lambda n, i: (n, i, 0, 0)),
            pl.BlockSpec((1, 1, 2, cout), lambda n, i: (n, i, 0, 0)),
        ),
        out_shape=(
            jax.ShapeDtypeStruct((N, H, W, cout), jnp.float32),
            jax.ShapeDtypeStruct((N, nblk, 2, cout), jnp.float32),
        ),
        compiler_params=pltpu.CompilerParams(
            dimension_semantics=("parallel", "parallel"),
            vmem_limit_bytes=_VMEM_LIMIT),
    )(x, x, x, w_flat, scale, shift)


def _norm_relu(z, scale, shift, *, block_rows):
    N, H, W, C = z.shape
    TH = block_rows
    nblk = H // TH
    vec = pl.BlockSpec((1, C), lambda n, i: (0, 0))
    return pl.pallas_call(
        _norm_relu_kernel,
        grid=(N, nblk),
        in_specs=[pl.BlockSpec((1, TH, W, C), lambda n, i: (n, i, 0, 0)), vec, vec],
        out_specs=pl.BlockSpec((1, TH, W, C), lambda n, i: (n, i, 0, 0)),
        out_shape=jax.ShapeDtypeStruct((N, H, W, C), jnp.float32),
        compiler_params=pltpu.CompilerParams(
            dimension_semantics=("parallel", "parallel"),
            vmem_limit_bytes=_VMEM_LIMIT),
    )(z, scale, shift)


def _bn_scale_shift(stats, gamma, beta, count):
    """Fold BN(train-mode) mean/var/gamma/beta into per-channel scale & shift.

    stats: (N, nblk, 2, C) per-tile [sum, sum_sq]  ->  tiny plain-JAX reduction.
    """
    s = jnp.sum(stats, axis=(0, 1))                        # (2, C)
    mean = s[0] / count
    var = jnp.maximum(s[1] / count - mean * mean, 0.0)     # biased var (BN training)
    inv = jax.lax.rsqrt(var + EPS)
    scale = gamma * inv
    shift = beta - mean * scale
    return scale.reshape(1, -1), shift.reshape(1, -1)


@functools.partial(jax.jit, static_argnames=("block_rows",))
def double_conv(x_nchw, w1, g1, b1, w2, g2, b2, *, block_rows=8):
    """DoubleConv forward (Conv3x3->BN->ReLU x2). Input/output NCHW."""
    N, Cin, H, W = x_nchw.shape
    Cout = w1.shape[-1]

    # Pick a row-band height that divides H (budget tiles for the smallest VMEM gen).
    th = min(block_rows, H)
    while H % th:
        th -= 1

    x = jnp.transpose(x_nchw, (0, 2, 3, 1))                     # NCHW -> NHWC (XLA glue)
    # Fold the 3x3 taps into the contraction dim; pre-cast weights to bf16 (MXU dtype).
    w1f = w1.reshape(9 * Cin, Cout).astype(jnp.bfloat16)
    w2f = w2.reshape(9 * Cout, Cout).astype(jnp.bfloat16)

    count = float(N * H * W)
    dummy = jnp.zeros((1, Cin), jnp.float32)

    # Pass 1a: conv1 + per-tile BN1 statistics.
    z1, st1 = _conv3x3_stats(x, w1f, dummy, dummy, Cout,
                             block_rows=th, fuse_input_norm=False)
    s1, t1 = _bn_scale_shift(st1, g1, b1, count)

    # Pass 1b/2a: BN1+ReLU fused into conv2's input path (+ BN2 statistics);
    # the normalized activation y1 never hits HBM.
    z2, st2 = _conv3x3_stats(z1, w2f, s1, t1, Cout,
                             block_rows=th, fuse_input_norm=True)
    s2, t2 = _bn_scale_shift(st2, g2, b2, count)

    # Pass 2b: final BN2+ReLU.
    y2 = _norm_relu(z2, s2, t2, block_rows=th)
    return jnp.transpose(y2, (0, 3, 1, 2))                      # NHWC -> NCHW

    # TODO(synk): BatchNorm running_mean/running_var updates (track_running_stats)
    # are training-side state, not part of the forward output, so they are omitted.


# ---------------- pure-JAX reference (for a correctness check) ----------------
def _reference(x_nchw, w1, g1, b1, w2, g2, b2):
    x = jnp.transpose(x_nchw, (0, 2, 3, 1))

    def conv(x, w):
        return jax.lax.conv_general_dilated(
            x, w, window_strides=(1, 1), padding=((1, 1), (1, 1)),
            dimension_numbers=("NHWC", "HWIO", "NHWC"),
            precision=jax.lax.Precision.HIGHEST)

    def bn_relu(y, g, b):
        mean = jnp.mean(y, axis=(0, 1, 2), keepdims=True)
        var = jnp.mean((y - mean) ** 2, axis=(0, 1, 2), keepdims=True)
        return jnp.maximum((y - mean) * jax.lax.rsqrt(var + EPS) * g + b, 0.0)

    h = bn_relu(conv(x, w1), g1, b1)
    h = bn_relu(conv(h, w2), g2, b2)
    return jnp.transpose(h, (0, 3, 1, 2))


if __name__ == "__main__":
    N, Cin, Cout, H, W = 2, 4, 8, 16, 16

    key = jax.random.PRNGKey(0)
    ks = jax.random.split(key, 7)
    x = jax.random.normal(ks[0], (N, Cin, H, W), jnp.float32)

    # Deterministic synthetic parameters (Conv2d bias=False since norm_type='batch').
    w1 = 0.2 * jax.random.normal(ks[1], (3, 3, Cin, Cout), jnp.float32)   # HWIO
    w2 = 0.2 * jax.random.normal(ks[2], (3, 3, Cout, Cout), jnp.float32)  # HWIO
    g1 = 1.0 + 0.1 * jax.random.normal(ks[3], (Cout,), jnp.float32)
    b1 = 0.1 * jax.random.normal(ks[4], (Cout,), jnp.float32)
    g2 = 1.0 + 0.1 * jax.random.normal(ks[5], (Cout,), jnp.float32)
    b2 = 0.1 * jax.random.normal(ks[6], (Cout,), jnp.float32)

    out = double_conv(x, w1, g1, b1, w2, g2, b2)   # block_rows=8 -> 2 row bands, halos exercised
    out = jax.block_until_ready(out)
    assert out.shape == (N, Cout, H, W), out.shape

    ref = _reference(x, w1, g1, b1, w2, g2, b2)
    max_err = float(jnp.max(jnp.abs(out - ref)))
    # bf16 MXU inputs (f32 accumulation) across two stacked convs -> relax tolerance.
    assert jnp.allclose(out, ref, atol=5e-2, rtol=5e-2), f"max_err={max_err}"

    print("KERNEL_OK")
</pallas_src>

<mosaic_0001>
module attributes {stable_mosaic.version = 11 : i64} {
  func.func @_norm_relu_kernel(%arg0: i32, %arg1: i32, %arg2: memref<1x8x16x8xf32, #tpu.memory_space<vmem>>, %arg3: memref<1x8xf32, #tpu.memory_space<vmem>>, %arg4: memref<1x8xf32, #tpu.memory_space<vmem>>, %arg5: memref<1x8x16x8xf32, #tpu.memory_space<vmem>>) attributes {dimension_semantics = [#tpu.dimension_semantics<parallel>, #tpu.dimension_semantics<parallel>], iteration_bounds = array<i64: 2, 2>, scalar_prefetch = 0 : i64, scratch_operands = 0 : i64, tpu.core_type = #tpu.core_type<tc>, window_params = [{transform_indices = @transform_0, window_bounds = array<i64: 1, 8, 16, 8>}, {pipeline_mode = #tpu.pipeline_mode<synchronous>, transform_indices = @transform_1, window_bounds = array<i64: 1, 8>}, {pipeline_mode = #tpu.pipeline_mode<synchronous>, transform_indices = @transform_2, window_bounds = array<i64: 1, 8>}, {transform_indices = @transform_3, window_bounds = array<i64: 1, 8, 16, 8>}]} {
    %c0 = arith.constant 0 : index
    %c0_0 = arith.constant 0 : index
    %c0_1 = arith.constant 0 : index
    %c0_2 = arith.constant 0 : index
    %0 = vector.load %arg2[%c0, %c0_0, %c0_1, %c0_2] : memref<1x8x16x8xf32, #tpu.memory_space<vmem>>, vector<1x8x16x8xf32>
    %c0_3 = arith.constant 0 : index
    %c0_4 = arith.constant 0 : index
    %1 = vector.load %arg3[%c0_3, %c0_4] : memref<1x8xf32, #tpu.memory_space<vmem>>, vector<1x8xf32>
    %2 = vector.shape_cast %1 : vector<1x8xf32> to vector<1x1x1x8xf32>
    %3 = vector.broadcast %2 : vector<1x1x1x8xf32> to vector<1x8x16x8xf32>
    %4 = arith.mulf %0, %3 : vector<1x8x16x8xf32>
    %c0_5 = arith.constant 0 : index
    %c0_6 = arith.constant 0 : index
    %5 = vector.load %arg4[%c0_5, %c0_6] : memref<1x8xf32, #tpu.memory_space<vmem>>, vector<1x8xf32>
    %6 = vector.shape_cast %5 : vector<1x8xf32> to vector<1x1x1x8xf32>
    %7 = vector.broadcast %6 : vector<1x1x1x8xf32> to vector<1x8x16x8xf32>
    %8 = arith.addf %4, %7 : vector<1x8x16x8xf32>
    %cst = arith.constant 0.000000e+00 : f32
    %9 = vector.broadcast %cst : f32 to vector<1x8x16x8xf32>
    %10 = arith.maximumf %8, %9 : vector<1x8x16x8xf32>
    %c0_7 = arith.constant 0 : index
    %c0_8 = arith.constant 0 : index
    %c0_9 = arith.constant 0 : index
    %c0_10 = arith.constant 0 : index
    %11 = vector.load %arg5[%c0_7, %c0_8, %c0_9, %c0_10] : memref<1x8x16x8xf32, #tpu.memory_space<vmem>>, vector<1x8x16x8xf32>
    tpu.vector_store %arg5[%c0_7, %c0_8, %c0_9, %c0_10], %10 {strides = array<i32>} : memref<1x8x16x8xf32, #tpu.memory_space<vmem>>, vector<1x8x16x8xf32>,
    return
  }
  func.func @transform_0(%arg0: i32, %arg1: i32) -> (i32, i32, i32, i32) {
    %c0_i32 = arith.constant 0 : i32
    %c0_i32_0 = arith.constant 0 : i32
    %c0_i32_1 = arith.constant 0 : i32
    return %arg0, %arg1, %c0_i32, %c0_i32_0 : i32, i32, i32, i32
  }
  func.func @transform_1(%arg0: i32, %arg1: i32) -> (i32, i32) {
    %c0_i32 = arith.constant 0 : i32
    %c0_i32_0 = arith.constant 0 : i32
    %c0_i32_1 = arith.constant 0 : i32
    return %c0_i32, %c0_i32_0 : i32, i32
  }
  func.func @transform_2(%arg0: i32, %arg1: i32) -> (i32, i32) {
    %c0_i32 = arith.constant 0 : i32
    %c0_i32_0 = arith.constant 0 : i32
    %c0_i32_1 = arith.constant 0 : i32
    return %c0_i32, %c0_i32_0 : i32, i32
  }
  func.func @transform_3(%arg0: i32, %arg1: i32) -> (i32, i32, i32, i32) {
    %c0_i32 = arith.constant 0 : i32
    %c0_i32_0 = arith.constant 0 : i32
    %c0_i32_1 = arith.constant 0 : i32
    return %arg0, %arg1, %c0_i32, %c0_i32_0 : i32, i32, i32, i32
  }
}

module attributes {stable_mosaic.version = 11 : i64} {
  func.func @_conv_stats_kernel(%arg0: i32, %arg1: i32, %arg2: memref<1x8x16x4xf32, #tpu.memory_space<vmem>>, %arg3: memref<1x1x16x4xf32, #tpu.memory_space<vmem>>, %arg4: memref<1x1x16x4xf32, #tpu.memory_space<vmem>>, %arg5: memref<36x8xbf16, #tpu.memory_space<vmem>>, %arg6: memref<1x4xf32, #tpu.memory_space<vmem>>, %arg7: memref<1x4xf32, #tpu.memory_space<vmem>>, %arg8: memref<1x8x16x8xf32, #tpu.memory_space<vmem>>, %arg9: memref<1x1x2x8xf32, #tpu.memory_space<vmem>>) attributes {dimension_semantics = [#tpu.dimension_semantics<parallel>, #tpu.dimension_semantics<parallel>], iteration_bounds = array<i64: 2, 2>, scalar_prefetch = 0 : i64, scratch_operands = 0 : i64, tpu.core_type = #tpu.core_type<tc>, window_params = [{transform_indices = @transform_0, window_bounds = array<i64: 1, 8, 16, 4>}, {transform_indices = @transform_1, window_bounds = array<i64: 1, 1, 16, 4>}, {transform_indices = @transform_2, window_bounds = array<i64: 1, 1, 16, 4>}, {pipeline_mode = #tpu.pipeline_mode<synchronous>, transform_indices = @transform_3, window_bounds = array<i64: 36, 8>}, {pipeline_mode = #tpu.pipeline_mode<synchronous>, transform_indices = @transform_4, window_bounds = array<i64: 1, 4>}, {pipeline_mode = #tpu.pipeline_mode<synchronous>, transform_indices = @transform_5, window_bounds = array<i64: 1, 4>}, {transform_indices = @transform_6, window_bounds = array<i64: 1, 8, 16, 8>}, {transform_indices = @transform_7, window_bounds = array<i64: 1, 1, 2, 8>}]} {
    %c0 = arith.constant 0 : index
    %c0_0 = arith.constant 0 : index
    %c0_1 = arith.constant 0 : index
    %c0_2 = arith.constant 0 : index
    %0 = vector.load %arg2[%c0, %c0_0, %c0_1, %c0_2] : memref<1x8x16x4xf32, #tpu.memory_space<vmem>>, vector<1x8x16x4xf32>
    %1 = vector.shape_cast %0 : vector<1x8x16x4xf32> to vector<8x16x4xf32>
    %c0_3 = arith.constant 0 : index
    %c0_4 = arith.constant 0 : index
    %c0_5 = arith.constant 0 : index
    %c0_6 = arith.constant 0 : index
    %2 = vector.load %arg3[%c0_3, %c0_4, %c0_5, %c0_6] : memref<1x1x16x4xf32, #tpu.memory_space<vmem>>, vector<1x1x16x4xf32>
    %3 = vector.shape_cast %2 : vector<1x1x16x4xf32> to vector<1x16x4xf32>
    %c0_7 = arith.constant 0 : index
    %c0_8 = arith.constant 0 : index
    %c0_9 = arith.constant 0 : index
    %c0_10 = arith.constant 0 : index
    %4 = vector.load %arg4[%c0_7, %c0_8, %c0_9, %c0_10] : memref<1x1x16x4xf32, #tpu.memory_space<vmem>>, vector<1x1x16x4xf32>
    %5 = vector.shape_cast %4 : vector<1x1x16x4xf32> to vector<1x16x4xf32>
    %c0_i32 = arith.constant 0 : i32
    %6 = arith.cmpi sgt, %arg1, %c0_i32 : i32
    %7 = arith.extui %6 : i1 to i32
    %8 = arith.sitofp %7 : i32 to f32
    %9 = vector.broadcast %8 : f32 to vector<1x16x4xf32>
    %10 = arith.mulf %3, %9 : vector<1x16x4xf32>
    %c1_i32 = arith.constant 1 : i32
    %11 = arith.cmpi slt, %arg1, %c1_i32 : i32
    %12 = arith.extui %11 : i1 to i32
    %13 = arith.sitofp %12 : i32 to f32
    %14 = vector.broadcast %13 : f32 to vector<1x16x4xf32>
    %15 = arith.mulf %5, %14 : vector<1x16x4xf32>
    %16 = tpu.concatenate %10, %1, %15 in 0 : vector<1x16x4xf32>, vector<8x16x4xf32>, vector<1x16x4xf32> -> vector<10x16x4xf32>
    %17 = arith.truncf %16 : vector<10x16x4xf32> to vector<10x16x4xbf16>
    %cst = arith.constant 0.000000e+00 : bf16
    %18 = vector.broadcast %cst : bf16 to vector<10x1x4xbf16>
    %19 = tpu.concatenate %18, %17, %18 in 1 : vector<10x1x4xbf16>, vector<10x16x4xbf16>, vector<10x1x4xbf16> -> vector<10x18x4xbf16>
    %20 = vector.extract_strided_slice %19 {offsets = [0, 0, 0], sizes = [8, 16, 4], strides = [1, 1, 1]} : vector<10x18x4xbf16> to vector<8x16x4xbf16>
    %21 = vector.shape_cast %20 : vector<8x16x4xbf16> to vector<128x4xbf16>
    %22 = vector.extract_strided_slice %19 {offsets = [0, 1, 0], sizes = [8, 16, 4], strides = [1, 1, 1]} : vector<10x18x4xbf16> to vector<8x16x4xbf16>
    %23 = vector.shape_cast %22 : vector<8x16x4xbf16> to vector<128x4xbf16>
    %24 = vector.extract_strided_slice %19 {offsets = [0, 2, 0], sizes = [8, 16, 4], strides = [1, 1, 1]} : vector<10x18x4xbf16> to vector<8x16x4xbf16>
    %25 = vector.shape_cast %24 : vector<8x16x4xbf16> to vector<128x4xbf16>
    %26 = vector.extract_strided_slice %19 {offsets = [1, 0, 0], sizes = [8, 16, 4], strides = [1, 1, 1]} : vector<10x18x4xbf16> to vector<8x16x4xbf16>
    %27 = vector.shape_cast %26 : vector<8x16x4xbf16> to vector<128x4xbf16>
    %28 = vector.extract_strided_slice %19 {offsets = [1, 1, 0], sizes = [8, 16, 4], strides = [1, 1, 1]} : vector<10x18x4xbf16> to vector<8x16x4xbf16>
    %29 = vector.shape_cast %28 : vector<8x16x4xbf16> to vector<128x4xbf16>
    %30 = vector.extract_strided_slice %19 {offsets = [1, 2, 0], sizes = [8, 16, 4], strides = [1, 1, 1]} : vector<10x18x4xbf16> to vector<8x16x4xbf16>
    %31 = vector.shape_cast %30 : vector<8x16x4xbf16> to vector<128x4xbf16>
    %32 = vector.extract_strided_slice %19 {offsets = [2, 0, 0], sizes = [8, 16, 4], strides = [1, 1, 1]} : vector<10x18x4xbf16> to vector<8x16x4xbf16>
    %33 = vector.shape_cast %32 : vector<8x16x4xbf16> to vector<128x4xbf16>
    %34 = vector.extract_strided_slice %19 {offsets = [2, 1, 0], sizes = [8, 16, 4], strides = [1, 1, 1]} : vector<10x18x4xbf16> to vector<8x16x4xbf16>
    %35 = vector.shape_cast %34 : vector<8x16x4xbf16> to vector<128x4xbf16>
    %36 = vector.extract_strided_slice %19 {offsets = [2, 2, 0], sizes = [8, 16, 4], strides = [1, 1, 1]} : vector<10x18x4xbf16> to vector<8x16x4xbf16>
    %37 = vector.shape_cast %36 : vector<8x16x4xbf16> to vector<128x4xbf16>
    %38 = tpu.concatenate %21, %23, %25, %27, %29, %31, %33, %35, %37 in 1 : vector<128x4xbf16>, vector<128x4xbf16>, vector<128x4xbf16>, vector<128x4xbf16>, vector<128x4xbf16>, vector<128x4xbf16>, vector<128x4xbf16>, vector<128x4xbf16>, vector<128x4xbf16> -> vector<128x36xbf16>
    %c0_11 = arith.constant 0 : index
    %c0_12 = arith.constant 0 : index
    %39 = vector.load %arg5[%c0_11, %c0_12] : memref<36x8xbf16, #tpu.memory_space<vmem>>, vector<36x8xbf16>
    %cst_13 = arith.constant dense<0.000000e+00> : vector<128x8xf32>
    %40 = tpu.matmul %38, %39, %cst_13 {dimension_numbers = #tpu.dot_dimension_numbers<[1], [0], [0], [1], [0, 0, 1, 1], [], []>} : vector<128x36xbf16>, vector<36x8xbf16>, vector<128x8xf32> -> vector<128x8xf32>
    %41 = vector.shape_cast %40 : vector<128x8xf32> to vector<1x8x16x8xf32>
    %c0_14 = arith.constant 0 : index
    %c0_15 = arith.constant 0 : index
    %c0_16 = arith.constant 0 : index
    %c0_17 = arith.constant 0 : index
    %42 = vector.load %arg8[%c0_14, %c0_15, %c0_16, %c0_17] : memref<1x8x16x8xf32, #tpu.memory_space<vmem>>, vector<1x8x16x8xf32>
    tpu.vector_store %arg8[%c0_14, %c0_15, %c0_16, %c0_17], %41 {strides = array<i32>} : memref<1x8x16x8xf32, #tpu.memory_space<vmem>>, vector<1x8x16x8xf32>,
    %cst_18 = arith.constant dense<0.000000e+00> : vector<8xf32>
    %43 = vector.multi_reduction <add>, %40, %cst_18 [0] : vector<128x8xf32> to vector<8xf32>
    %44 = arith.mulf %40, %40 : vector<128x8xf32>
    %cst_19 = arith.constant dense<0.000000e+00> : vector<8xf32>
    %45 = vector.multi_reduction <add>, %44, %cst_19 [0] : vector<128x8xf32> to vector<8xf32>
    %46 = vector.shape_cast %43 : vector<8xf32> to vector<1x8xf32>
    %47 = vector.shape_cast %45 : vector<8xf32> to vector<1x8xf32>
    %48 = tpu.concatenate %46, %47 in 0 : vector<1x8xf32>, vector<1x8xf32> -> vector<2x8xf32>
    %49 = vector.shape_cast %48 : vector<2x8xf32> to vector<1x1x2x8xf32>
    %c0_20 = arith.constant 0 : index
    %c0_21 = arith.constant 0 : index
    %c0_22 = arith.constant 0 : index
    %c0_23 = arith.constant 0 : index
    %50 = vector.load %arg9[%c0_20, %c0_21, %c0_22, %c0_23] : memref<1x1x2x8xf32, #tpu.memory_space<vmem>>, vector<1x1x2x8xf32>
    tpu.vector_store %arg9[%c0_20, %c0_21, %c0_22, %c0_23], %49 {strides = array<i32>} : memref<1x1x2x8xf32, #tpu.memory_space<vmem>>, vector<1x1x2x8xf32>,
    return
  }
  func.func @transform_0(%arg0: i32, %arg1: i32) -> (i32, i32, i32, i32) {
    %c0_i32 = arith.constant 0 : i32
    %c0_i32_0 = arith.constant 0 : i32
    %c0_i32_1 = arith.constant 0 : i32
    return %arg0, %arg1, %c0_i32, %c0_i32_0 : i32, i32, i32, i32
  }
  func.func @transform_1(%arg0: i32, %arg1: i32) -> (i32, i32, i32, i32) {
    %c8_i32 = arith.constant 8 : i32
    %0 = arith.muli %arg1, %c8_i32 : i32
    %c1_i32 = arith.constant 1 : i32
    %1 = arith.subi %0, %c1_i32 : i32
    %c0_i32 = arith.constant 0 : i32
    %2 = arith.maxsi %1, %c0_i32 : i32
    %c0_i32_0 = arith.constant 0 : i32
    %c0_i32_1 = arith.constant 0 : i32
    %c0_i32_2 = arith.constant 0 : i32
    return %arg0, %2, %c0_i32_0, %c0_i32_1 : i32, i32, i32, i32
  }
  func.func @transform_2(%arg0: i32, %arg1: i32) -> (i32, i32, i32, i32) {
    %c8_i32 = arith.constant 8 : i32
    %0 = arith.muli %arg1, %c8_i32 : i32
    %c8_i32_0 = arith.constant 8 : i32
    %1 = arith.addi %0, %c8_i32_0 : i32
    %c15_i32 = arith.constant 15 : i32
    %2 = arith.minsi %1, %c15_i32 : i32
    %c0_i32 = arith.constant 0 : i32
    %c0_i32_1 = arith.constant 0 : i32
    %c0_i32_2 = arith.constant 0 : i32
    return %arg0, %2, %c0_i32, %c0_i32_1 : i32, i32, i32, i32
  }
  func.func @transform_3(%arg0: i32, %arg1: i32) -> (i32, i32) {
    %c0_i32 = arith.constant 0 : i32
    %c0_i32_0 = arith.constant 0 : i32
    %c0_i32_1 = arith.constant 0 : i32
    return %c0_i32, %c0_i32_0 : i32, i32
  }
  func.func @transform_4(%arg0: i32, %arg1: i32) -> (i32, i32) {
    %c0_i32 = arith.constant 0 : i32
    %c0_i32_0 = arith.constant 0 : i32
    %c0_i32_1 = arith.constant 0 : i32
    return %c0_i32, %c0_i32_0 : i32, i32
  }
  func.func @transform_5(%arg0: i32, %arg1: i32) -> (i32, i32) {
    %c0_i32 = arith.constant 0 : i32
    %c0_i32_0 = arith.constant 0 : i32
    %c0_i32_1 = arith.constant 0 : i32
    return %c0_i32, %c0_i32_0 : i32, i32
  }
  func.func @transform_6(%arg0: i32, %arg1: i32) -> (i32, i32, i32, i32) {
    %c0_i32 = arith.constant 0 : i32
    %c0_i32_0 = arith.constant 0 : i32
    %c0_i32_1 = arith.constant 0 : i32
    return %arg0, %arg1, %c0_i32, %c0_i32_0 : i32, i32, i32, i32
  }
  func.func @transform_7(%arg0: i32, %arg1: i32) -> (i32, i32, i32, i32) {
    %c0_i32 = arith.constant 0 : i32
    %c0_i32_0 = arith.constant 0 : i32
    %c0_i32_1 = arith.constant 0 : i32
    return %arg0, %arg1, %c0_i32, %c0_i32_0 : i32, i32, i32, i32
  }
}

module attributes {stable_mosaic.version = 11 : i64} {
  func.func @_conv_stats_kernel(%arg0: i32, %arg1: i32, %arg2: memref<1x8x16x8xf32, #tpu.memory_space<vmem>>, %arg3: memref<1x1x16x8xf32, #tpu.memory_space<vmem>>, %arg4: memref<1x1x16x8xf32, #tpu.memory_space<vmem>>, %arg5: memref<72x8xbf16, #tpu.memory_space<vmem>>, %arg6: memref<1x8xf32, #tpu.memory_space<vmem>>, %arg7: memref<1x8xf32, #tpu.memory_space<vmem>>, %arg8: memref<1x8x16x8xf32, #tpu.memory_space<vmem>>, %arg9: memref<1x1x2x8xf32, #tpu.memory_space<vmem>>) attributes {dimension_semantics = [#tpu.dimension_semantics<parallel>, #tpu.dimension_semantics<parallel>], iteration_bounds = array<i64: 2, 2>, scalar_prefetch = 0 : i64, scratch_operands = 0 : i64, tpu.core_type = #tpu.core_type<tc>, window_params = [{transform_indices = @transform_0, window_bounds = array<i64: 1, 8, 16, 8>}, {transform_indices = @transform_1, window_bounds = array<i64: 1, 1, 16, 8>}, {transform_indices = @transform_2, window_bounds = array<i64: 1, 1, 16, 8>}, {pipeline_mode = #tpu.pipeline_mode<synchronous>, transform_indices = @transform_3, window_bounds = array<i64: 72, 8>}, {pipeline_mode = #tpu.pipeline_mode<synchronous>, transform_indices = @transform_4, window_bounds = array<i64: 1, 8>}, {pipeline_mode = #tpu.pipeline_mode<synchronous>, transform_indices = @transform_5, window_bounds = array<i64: 1, 8>}, {transform_indices = @transform_6, window_bounds = array<i64: 1, 8, 16, 8>}, {transform_indices = @transform_7, window_bounds = array<i64: 1, 1, 2, 8>}]} {
    %c0 = arith.constant 0 : index
    %c0_0 = arith.constant 0 : index
    %c0_1 = arith.constant 0 : index
    %c0_2 = arith.constant 0 : index
    %0 = vector.load %arg2[%c0, %c0_0, %c0_1, %c0_2] : memref<1x8x16x8xf32, #tpu.memory_space<vmem>>, vector<1x8x16x8xf32>
    %1 = vector.shape_cast %0 : vector<1x8x16x8xf32> to vector<8x16x8xf32>
    %c0_3 = arith.constant 0 : index
    %c0_4 = arith.constant 0 : index
    %c0_5 = arith.constant 0 : index
    %c0_6 = arith.constant 0 : index
    %2 = vector.load %arg3[%c0_3, %c0_4, %c0_5, %c0_6] : memref<1x1x16x8xf32, #tpu.memory_space<vmem>>, vector<1x1x16x8xf32>
    %3 = vector.shape_cast %2 : vector<1x1x16x8xf32> to vector<1x16x8xf32>
    %c0_7 = arith.constant 0 : index
    %c0_8 = arith.constant 0 : index
    %c0_9 = arith.constant 0 : index
    %c0_10 = arith.constant 0 : index
    %4 = vector.load %arg4[%c0_7, %c0_8, %c0_9, %c0_10] : memref<1x1x16x8xf32, #tpu.memory_space<vmem>>, vector<1x1x16x8xf32>
    %5 = vector.shape_cast %4 : vector<1x1x16x8xf32> to vector<1x16x8xf32>
    %c0_11 = arith.constant 0 : index
    %c0_12 = arith.constant 0 : index
    %6 = vector.load %arg6[%c0_11, %c0_12] : memref<1x8xf32, #tpu.memory_space<vmem>>, vector<1x8xf32>
    %c0_13 = arith.constant 0 : index
    %c0_14 = arith.constant 0 : index
    %7 = vector.load %arg7[%c0_13, %c0_14] : memref<1x8xf32, #tpu.memory_space<vmem>>, vector<1x8xf32>
    %8 = vector.shape_cast %6 : vector<1x8xf32> to vector<1x1x8xf32>
    %9 = vector.broadcast %8 : vector<1x1x8xf32> to vector<8x16x8xf32>
    %10 = arith.mulf %1, %9 : vector<8x16x8xf32>
    %11 = vector.shape_cast %7 : vector<1x8xf32> to vector<1x1x8xf32>
    %12 = vector.broadcast %11 : vector<1x1x8xf32> to vector<8x16x8xf32>
    %13 = arith.addf %10, %12 : vector<8x16x8xf32>
    %cst = arith.constant 0.000000e+00 : f32
    %14 = vector.broadcast %cst : f32 to vector<8x16x8xf32>
    %15 = arith.maximumf %13, %14 : vector<8x16x8xf32>
    %16 = vector.shape_cast %6 : vector<1x8xf32> to vector<1x1x8xf32>
    %17 = vector.broadcast %16 : vector<1x1x8xf32> to vector<1x16x8xf32>
    %18 = arith.mulf %3, %17 : vector<1x16x8xf32>
    %19 = vector.shape_cast %7 : vector<1x8xf32> to vector<1x1x8xf32>
    %20 = vector.broadcast %19 : vector<1x1x8xf32> to vector<1x16x8xf32>
    %21 = arith.addf %18, %20 : vector<1x16x8xf32>
    %cst_15 = arith.constant 0.000000e+00 : f32
    %22 = vector.broadcast %cst_15 : f32 to vector<1x16x8xf32>
    %23 = arith.maximumf %21, %22 : vector<1x16x8xf32>
    %24 = vector.shape_cast %6 : vector<1x8xf32> to vector<1x1x8xf32>
    %25 = vector.broadcast %24 : vector<1x1x8xf32> to vector<1x16x8xf32>
    %26 = arith.mulf %5, %25 : vector<1x16x8xf32>
    %27 = vector.shape_cast %7 : vector<1x8xf32> to vector<1x1x8xf32>
    %28 = vector.broadcast %27 : vector<1x1x8xf32> to vector<1x16x8xf32>
    %29 = arith.addf %26, %28 : vector<1x16x8xf32>
    %cst_16 = arith.constant 0.000000e+00 : f32
    %30 = vector.broadcast %cst_16 : f32 to vector<1x16x8xf32>
    %31 = arith.maximumf %29, %30 : vector<1x16x8xf32>
    %c0_i32 = arith.constant 0 : i32
    %32 = arith.cmpi sgt, %arg1, %c0_i32 : i32
    %33 = arith.extui %32 : i1 to i32
    %34 = arith.sitofp %33 : i32 to f32
    %35 = vector.broadcast %34 : f32 to vector<1x16x8xf32>
    %36 = arith.mulf %23, %35 : vector<1x16x8xf32>
    %c1_i32 = arith.constant 1 : i32
    %37 = arith.cmpi slt, %arg1, %c1_i32 : i32
    %38 = arith.extui %37 : i1 to i32
    %39 = arith.sitofp %38 : i32 to f32
    %40 = vector.broadcast %39 : f32 to vector<1x16x8xf32>
    %41 = arith.mulf %31, %40 : vector<1x16x8xf32>
    %42 = tpu.concatenate %36, %15, %41 in 0 : vector<1x16x8xf32>, vector<8x16x8xf32>, vector<1x16x8xf32> -> vector<10x16x8xf32>
    %43 = arith.truncf %42 : vector<10x16x8xf32> to vector<10x16x8xbf16>
    %cst_17 = arith.constant 0.000000e+00 : bf16
    %44 = vector.broadcast %cst_17 : bf16 to vector<10x1x8xbf16>
    %45 = tpu.concatenate %44, %43, %44 in 1 : vector<10x1x8xbf16>, vector<10x16x8xbf16>, vector<10x1x8xbf16> -> vector<10x18x8xbf16>
    %46 = vector.extract_strided_slice %45 {offsets = [0, 0, 0], sizes = [8, 16, 8], strides = [1, 1, 1]} : vector<10x18x8xbf16> to vector<8x16x8xbf16>
    %47 = vector.shape_cast %46 : vector<8x16x8xbf16> to vector<128x8xbf16>
    %48 = vector.extract_strided_slice %45 {offsets = [0, 1, 0], sizes = [8, 16, 8], strides = [1, 1, 1]} : vector<10x18x8xbf16> to vector<8x16x8xbf16>
    %49 = vector.shape_cast %48 : vector<8x16x8xbf16> to vector<128x8xbf16>
    %50 = vector.extract_strided_slice %45 {offsets = [0, 2, 0], sizes = [8, 16, 8], strides = [1, 1, 1]} : vector<10x18x8xbf16> to vector<8x16x8xbf16>
    %51 = vector.shape_cast %50 : vector<8x16x8xbf16> to vector<128x8xbf16>
    %52 = vector.extract_strided_slice %45 {offsets = [1, 0, 0], sizes = [8, 16, 8], strides = [1, 1, 1]} : vector<10x18x8xbf16> to vector<8x16x8xbf16>
    %53 = vector.shape_cast %52 : vector<8x16x8xbf16> to vector<128x8xbf16>
    %54 = vector.extract_strided_slice %45 {offsets = [1, 1, 0], sizes = [8, 16, 8], strides = [1, 1, 1]} : vector<10x18x8xbf16> to vector<8x16x8xbf16>
    %55 = vector.shape_cast %54 : vector<8x16x8xbf16> to vector<128x8xbf16>
    %56 = vector.extract_strided_slice %45 {offsets = [1, 2, 0], sizes = [8, 16, 8], strides = [1, 1, 1]} : vector<10x18x8xbf16> to vector<8x16x8xbf16>
    %57 = vector.shape_cast %56 : vector<8x16x8xbf16> to vector<128x8xbf16>
    %58 = vector.extract_strided_slice %45 {offsets = [2, 0, 0], sizes = [8, 16, 8], strides = [1, 1, 1]} : vector<10x18x8xbf16> to vector<8x16x8xbf16>
    %59 = vector.shape_cast %58 : vector<8x16x8xbf16> to vector<128x8xbf16>
    %60 = vector.extract_strided_slice %45 {offsets = [2, 1, 0], sizes = [8, 16, 8], strides = [1, 1, 1]} : vector<10x18x8xbf16> to vector<8x16x8xbf16>
    %61 = vector.shape_cast %60 : vector<8x16x8xbf16> to vector<128x8xbf16>
    %62 = vector.extract_strided_slice %45 {offsets = [2, 2, 0], sizes = [8, 16, 8], strides = [1, 1, 1]} : vector<10x18x8xbf16> to vector<8x16x8xbf16>
    %63 = vector.shape_cast %62 : vector<8x16x8xbf16> to vector<128x8xbf16>
    %64 = tpu.concatenate %47, %49, %51, %53, %55, %57, %59, %61, %63 in 1 : vector<128x8xbf16>, vector<128x8xbf16>, vector<128x8xbf16>, vector<128x8xbf16>, vector<128x8xbf16>, vector<128x8xbf16>, vector<128x8xbf16>, vector<128x8xbf16>, vector<128x8xbf16> -> vector<128x72xbf16>
    %c0_18 = arith.constant 0 : index
    %c0_19 = arith.constant 0 : index
    %65 = vector.load %arg5[%c0_18, %c0_19] : memref<72x8xbf16, #tpu.memory_space<vmem>>, vector<72x8xbf16>
    %cst_20 = arith.constant dense<0.000000e+00> : vector<128x8xf32>
    %66 = tpu.matmul %64, %65, %cst_20 {dimension_numbers = #tpu.dot_dimension_numbers<[1], [0], [0], [1], [0, 0, 1, 1], [], []>} : vector<128x72xbf16>, vector<72x8xbf16>, vector<128x8xf32> -> vector<128x8xf32>
    %67 = vector.shape_cast %66 : vector<128x8xf32> to vector<1x8x16x8xf32>
    %c0_21 = arith.constant 0 : index
    %c0_22 = arith.constant 0 : index
    %c0_23 = arith.constant 0 : index
    %c0_24 = arith.constant 0 : index
    %68 = vector.load %arg8[%c0_21, %c0_22, %c0_23, %c0_24] : memref<1x8x16x8xf32, #tpu.memory_space<vmem>>, vector<1x8x16x8xf32>
    tpu.vector_store %arg8[%c0_21, %c0_22, %c0_23, %c0_24], %67 {strides = array<i32>} : memref<1x8x16x8xf32, #tpu.memory_space<vmem>>, vector<1x8x16x8xf32>,
    %cst_25 = arith.constant dense<0.000000e+00> : vector<8xf32>
    %69 = vector.multi_reduction <add>, %66, %cst_25 [0] : vector<128x8xf32> to vector<8xf32>
    %70 = arith.mulf %66, %66 : vector<128x8xf32>
    %cst_26 = arith.constant dense<0.000000e+00> : vector<8xf32>
    %71 = vector.multi_reduction <add>, %70, %cst_26 [0] : vector<128x8xf32> to vector<8xf32>
    %72 = vector.shape_cast %69 : vector<8xf32> to vector<1x8xf32>
    %73 = vector.shape_cast %71 : vector<8xf32> to vector<1x8xf32>
    %74 = tpu.concatenate %72, %73 in 0 : vector<1x8xf32>, vector<1x8xf32> -> vector<2x8xf32>
    %75 = vector.shape_cast %74 : vector<2x8xf32> to vector<1x1x2x8xf32>
    %c0_27 = arith.constant 0 : index
    %c0_28 = arith.constant 0 : index
    %c0_29 = arith.constant 0 : index
    %c0_30 = arith.constant 0 : index
    %76 = vector.load %arg9[%c0_27, %c0_28, %c0_29, %c0_30] : memref<1x1x2x8xf32, #tpu.memory_space<vmem>>, vector<1x1x2x8xf32>
    tpu.vector_store %arg9[%c0_27, %c0_28, %c0_29, %c0_30], %75 {strides = array<i32>} : memref<1x1x2x8xf32, #tpu.memory_space<vmem>>, vector<1x1x2x8xf32>,
    return
  }
  func.func @transform_0(%arg0: i32, %arg1: i32) -> (i32, i32, i32, i32) {
    %c0_i32 = arith.constant 0 : i32
    %c0_i32_0 = arith.constant 0 : i32
    %c0_i32_1 = arith.constant 0 : i32
    return %arg0, %arg1, %c0_i32, %c0_i32_0 : i32, i32, i32, i32
  }
  func.func @transform_1(%arg0: i32, %arg1: i32) -> (i32, i32, i32, i32) {
    %c8_i32 = arith.constant 8 : i32
    %0 = arith.muli %arg1, %c8_i32 : i32
    %c1_i32 = arith.constant 1 : i32
    %1 = arith.subi %0, %c1_i32 : i32
    %c0_i32 = arith.constant 0 : i32
    %2 = arith.maxsi %1, %c0_i32 : i32
    %c0_i32_0 = arith.constant 0 : i32
    %c0_i32_1 = arith.constant 0 : i32
    %c0_i32_2 = arith.constant 0 : i32
    return %arg0, %2, %c0_i32_0, %c0_i32_1 : i32, i32, i32, i32
  }
  func.func @transform_2(%arg0: i32, %arg1: i32) -> (i32, i32, i32, i32) {
    %c8_i32 = arith.constant 8 : i32
    %0 = arith.muli %arg1, %c8_i32 : i32
    %c8_i32_0 = arith.constant 8 : i32
    %1 = arith.addi %0, %c8_i32_0 : i32
    %c15_i32 = arith.constant 15 : i32
    %2 = arith.minsi %1, %c15_i32 : i32
    %c0_i32 = arith.constant 0 : i32
    %c0_i32_1 = arith.constant 0 : i32
    %c0_i32_2 = arith.constant 0 : i32
    return %arg0, %2, %c0_i32, %c0_i32_1 : i32, i32, i32, i32
  }
  func.func @transform_3(%arg0: i32, %arg1: i32) -> (i32, i32) {
    %c0_i32 = arith.constant 0 : i32
    %c0_i32_0 = arith.constant 0 : i32
    %c0_i32_1 = arith.constant 0 : i32
    return %c0_i32, %c0_i32_0 : i32, i32
  }
  func.func @transform_4(%arg0: i32, %arg1: i32) -> (i32, i32) {
    %c0_i32 = arith.constant 0 : i32
    %c0_i32_0 = arith.constant 0 : i32
    %c0_i32_1 = arith.constant 0 : i32
    return %c0_i32, %c0_i32_0 : i32, i32
  }
  func.func @transform_5(%arg0: i32, %arg1: i32) -> (i32, i32) {
    %c0_i32 = arith.constant 0 : i32
    %c0_i32_0 = arith.constant 0 : i32
    %c0_i32_1 = arith.constant 0 : i32
    return %c0_i32, %c0_i32_0 : i32, i32
  }
  func.func @transform_6(%arg0: i32, %arg1: i32) -> (i32, i32, i32, i32) {
    %c0_i32 = arith.constant 0 : i32
    %c0_i32_0 = arith.constant 0 : i32
    %c0_i32_1 = arith.constant 0 : i32
    return %arg0, %arg1, %c0_i32, %c0_i32_0 : i32, i32, i32, i32
  }
  func.func @transform_7(%arg0: i32, %arg1: i32) -> (i32, i32, i32, i32) {
    %c0_i32 = arith.constant 0 : i32
    %c0_i32_0 = arith.constant 0 : i32
    %c0_i32_1 = arith.constant 0 : i32
    return %arg0, %arg1, %c0_i32, %c0_i32_0 : i32, i32, i32, i32
  }
}

</mosaic_0001>

<bundles_post_ra>
// kernel: double_conv.5
= control target key start
LH: loop header
LB: loop body
LE: loop exit
PB: predicated region body
PF: predicated region fallthrough
CT: control target
= control target key end

     0   :  { %s526_s12 = smov 0   ;;  %s528_s13 = smov 0   ;;  %s671_s0 = inlined_call_operand.vmem [shape: f32[2,16,16,8], index: 0, kind: input, shape index: {}]   ;;  %s672_s1 = inlined_call_operand.vmem [shape: f32[1,8], index: 1, kind: input, shape index: {}]   ;;  %s673_s2 = inlined_call_operand.vmem [shape: f32[1,8], index: 2, kind: input, shape index: {}]   ;;  %s674_s3 = inlined_call_operand.vmem [shape: f32[2,16,16,8], index: 3, kind: output, shape index: {}]  }
   0x1   :  { %s530_s14 = smov 0   ;;  %s532_s15 = smov 0  }
   0x2   :  { %s534_s16 = smov 0  }
   0x3 LB: > { %s22_s17 = sadd.s32 1, %s496_s14  ;;  %s25_s18 = sadd.s32 1, %s500_s15  ;;  %s504_s16 = sphi %s534_s16, %s13_s16   ;;  %s500_s15 = sphi %s532_s15, %s678_s15   ;;  %s496_s14 = sphi %s530_s14, %s677_s14   ;;  %s492_s13 = sphi %s528_s13, %s676_s13   ;;  %s488_s12 = sphi %s526_s12, %s675_s12  }
   0x4   : > { %p23_p0 = scmp.ge.s32.totalorder %s22_s17, 2  ;;  %p413_p1 = scmp.ge.s32.totalorder %s504_s16, 1 }
   0x5   : > { %p159_p2 = scmp.lt.s32.totalorder %s504_s16, 5 }
   0x6   : > { %s680_s17 = smov (%p23_p0, %s22_s17), 0  ;;  %s682_s18 = smov (!%p23_p0, %s25_s18), %s500_s15 }
   0x7   : > { %p160_p3 = pnand %p413_p1, %p159_p2  ;;  %p27_p4 = scmp.ge.s32.totalorder %s682_s18, 2 }
   0x8   : > { %s414_s19 = sshll.u32 (!%p160_p3), %s488_s12, 3  ;;  %p194_p5 = scmp.lt.s32.totalorder (!%p160_p3), %s492_s13, 1 }
   0x9   : > { %s684_s18 = smov (%p27_p4, %s682_s18), 0  ;;  %163 = sbr.rel (%p160_p3) target bundleno = 37 (0x25), region = 32 }
   0xa   : > { %p196_p6 = scmp.lt.s32.totalorder (!%p160_p3), %s414_s19, 15 }
   0xe   : > { %s686_s13 = smov (!%p194_p5, %s492_s13), 1  ;;  %s688_s19 = smov (!%p196_p6, %s414_s19), 15  ;;  %v559_v0 = vld [vmem:[%s672_s1] ss:$0 sm:$0xff]  ;;  %vm293_vm0 = vcmask 64512  }
   0xf   : > { %s416_s20 = sshll.u32 %s686_s13, 5  ;;  %s415_s21 = sshll.u32 %s688_s19, 1  ;;  %v569_v1 = vld [vmem:[%s673_s2] ss:$0 sm:$0xff] }
  0x10   : > { %s200_s22 = sadd.s32 %s416_s20, %s415_s21 }
  0x11   : > { %s417_s23 = sshll.u32 %s200_s22, 3 }
  0x12   : > { %s564_s28 = scalar_lea.vmem %s671_s0, %s417_s23  ;;  %s592_s6 = scalar_lea.vmem %s674_s3, %s417_s23 }
  0x13   : > { %v215_v2 = vld [vmem:[%s564_s28] sm:$0xff]  ;;  %v216_v3 = vld [vmem:[%s564_s28 + $0x8] sm:$0xff]  ;;  %v217_v4 = vld [vmem:[%s564_s28 + $0x10] sm:$0xff] }
  0x14   : > { %v238_v5 = vmul.f32 %v559_v0, %v215_v2  ;;  %v239_v6 = vmul.f32 %v559_v0, %v216_v3  ;;  %v240_v7 = vmul.f32 %v559_v0, %v217_v4  ;;  %v218_v8 = vld [vmem:[%s564_s28 + $0x18] sm:$0xff]  ;;  %v219_v9 = vld [vmem:[%s564_s28 + $0x20] sm:$0xff]  ;;  %v220_v10 = vld [vmem:[%s564_s28 + $0x28] sm:$0xff] }
  0x15   : > { %v241_v11 = vmul.f32 %v559_v0, %v218_v8  ;;  %v242_v12 = vmul.f32 %v559_v0, %v219_v9  ;;  %v243_v13 = vmul.f32 %v559_v0, %v220_v10  ;;  %v221_v14 = vld [vmem:[%s564_s28 + $0x30] sm:$0xff]  ;;  %v222_v15 = vld [vmem:[%s564_s28 + $0x38] sm:$0xff]  ;;  %v223_v24 = vld [vmem:[%s564_s28 + $0x40] sm:$0xff] }
  0x16   : > { %v261_v16 = vadd.f32 %v569_v1, %v238_v5  ;;  %v262_v17 = vadd.f32 %v569_v1, %v239_v6  ;;  %v263_v18 = vadd.f32 %v569_v1, %v240_v7  ;;  %v244_v19 = vmul.f32 %v559_v0, %v221_v14  ;;  %v224_v25 = vld [vmem:[%s564_s28 + $0x48] sm:$0xff]  ;;  %v225_v26 = vld [vmem:[%s564_s28 + $0x50] sm:$0xff]  ;;  %v226_v31 = vld [vmem:[%s564_s28 + $0x58] sm:$0xff] }
  0x17   : > { %v264_v20 = vadd.f32 %v569_v1, %v241_v11  ;;  %v265_v21 = vadd.f32 %v569_v1, %v242_v12  ;;  %v266_v22 = vadd.f32 %v569_v1, %v243_v13  ;;  %v245_v23 = vmul.f32 %v559_v0, %v222_v15  ;;  %v227_v32 = vld [vmem:[%s564_s28 + $0x60] sm:$0xff]  ;;  %v228_v33 = vld [vmem:[%s564_s28 + $0x68] sm:$0xff]  ;;  %v229_v38 = vld [vmem:[%s564_s28 + $0x70] sm:$0xff] }
  0x18   : > { %v277_v27 = vmax.f32 %v261_v16, 0.0  ;;  %v278_v28 = vmax.f32 %v262_v17, 0.0  ;;  %v279_v29 = vmax.f32 %v263_v18, 0.0  ;;  %v267_v30 = vadd.f32 %v569_v1, %v244_v19  ;;  %v230_v43 = vld [vmem:[%s564_s28 + $0x78] sm:$0xff] }
  0x19   : > { %v280_v34 = vmax.f32 %v264_v20, 0.0  ;;  %v281_v35 = vmax.f32 %v265_v21, 0.0  ;;  %v282_v36 = vmax.f32 %v266_v22, 0.0  ;;  %v268_v37 = vadd.f32 %v569_v1, %v245_v23 }
  0x1a   : > { %294 = vst.msk [vmem:[%s592_s6] sm:$0xff] %vm293_vm0, %v277_v27  ;;  %295 = vst.msk [vmem:[%s592_s6 + $0x8] sm:$0xff] %vm293_vm0, %v278_v28  ;;  %v283_v39 = vmax.f32 %v267_v30, 0.0  ;;  %v246_v40 = vmul.f32 %v559_v0, %v223_v24  ;;  %v247_v41 = vmul.f32 %v559_v0, %v224_v25  ;;  %v248_v42 = vmul.f32 %v559_v0, %v225_v26 }
  0x1b   : > { %296 = vst.msk [vmem:[%s592_s6 + $0x10] sm:$0xff] %vm293_vm0, %v279_v29  ;;  %297 = vst.msk [vmem:[%s592_s6 + $0x18] sm:$0xff] %vm293_vm0, %v280_v34  ;;  %v284_v44 = vmax.f32 %v268_v37, 0.0  ;;  %v249_v45 = vmul.f32 %v559_v0, %v226_v31  ;;  %v250_v46 = vmul.f32 %v559_v0, %v227_v32  ;;  %v251_v47 = vmul.f32 %v559_v0, %v228_v33 }
  0x1c   : > { %298 = vst.msk [vmem:[%s592_s6 + $0x20] sm:$0xff] %vm293_vm0, %v281_v35  ;;  %299 = vst.msk [vmem:[%s592_s6 + $0x28] sm:$0xff] %vm293_vm0, %v282_v36  ;;  %v269_v48 = vadd.f32 %v569_v1, %v246_v40  ;;  %v270_v49 = vadd.f32 %v569_v1, %v247_v41  ;;  %v271_v50 = vadd.f32 %v569_v1, %v248_v42 }
  0x1d   : > { %300 = vst.msk [vmem:[%s592_s6 + $0x30] sm:$0xff] %vm293_vm0, %v283_v39  ;;  %v252_v51 = vmul.f32 %v559_v0, %v229_v38  ;;  %301 = vst.msk [vmem:[%s592_s6 + $0x38] sm:$0xff] %vm293_vm0, %v284_v44  ;;  %v272_v52 = vadd.f32 %v569_v1, %v249_v45  ;;  %v273_v53 = vadd.f32 %v569_v1, %v250_v46 }
  0x1e   : > { %v274_v54 = vadd.f32 %v569_v1, %v251_v47  ;;  %v253_v55 = vmul.f32 %v559_v0, %v230_v43  ;;  %v285_v56 = vmax.f32 %v269_v48, 0.0  ;;  %v286_v57 = vmax.f32 %v270_v49, 0.0 }
  0x1f   : > { %v287_v58 = vmax.f32 %v271_v50, 0.0  ;;  %v275_v59 = vadd.f32 %v569_v1, %v252_v51  ;;  %v288_v60 = vmax.f32 %v272_v52, 0.0  ;;  %v289_v61 = vmax.f32 %v273_v53, 0.0 }
  0x20   : > { %v290_v62 = vmax.f32 %v274_v54, 0.0  ;;  %v276_v63 = vadd.f32 %v569_v1, %v253_v55  ;;  %302 = vst.msk [vmem:[%s592_s6 + $0x40] sm:$0xff] %vm293_vm0, %v285_v56  ;;  %303 = vst.msk [vmem:[%s592_s6 + $0x48] sm:$0xff] %vm293_vm0, %v286_v57 }
  0x21   : > { %304 = vst.msk [vmem:[%s592_s6 + $0x50] sm:$0xff] %vm293_vm0, %v287_v58  ;;  %v291_v2 = vmax.f32 %v275_v59, 0.0  ;;  %305 = vst.msk [vmem:[%s592_s6 + $0x58] sm:$0xff] %vm293_vm0, %v288_v60 }
  0x22   : > { %306 = vst.msk [vmem:[%s592_s6 + $0x60] sm:$0xff] %vm293_vm0, %v289_v61  ;;  %307 = vst.msk [vmem:[%s592_s6 + $0x68] sm:$0xff] %vm293_vm0, %v290_v62  ;;  %v292_v0 = vmax.f32 %v276_v63, 0.0 }
  0x23   : > { %308 = vst.msk [vmem:[%s592_s6 + $0x70] sm:$0xff] %vm293_vm0, %v291_v2 }
  0x24   : > { %309 = vst.msk [vmem:[%s592_s6 + $0x78] sm:$0xff] %vm293_vm0, %v292_v0 }
  0x25 PF: > { %s13_s16 = sadd.s32 1, %s504_s16   ;;  %s675_s12 = smov %s496_s14 }
  0x26   : > { %p10_p7 = scmp.ge.s32.totalorder %s13_s16, 6   ;;  %s676_s13 = smov %s500_s15 }
  0x27   : > { %s677_s14 = smov %s680_s17  ;;  %s678_s15 = smov %s684_s18 }
  0x28   :  { %12 = sbr.rel (!%p10_p7) target bundleno = 3 (0x3), region = 62 }

// kernel: double_conv.3
= control target key start
LH: loop header
LB: loop body
LE: loop exit
PB: predicated region body
PF: predicated region fallthrough
CT: control target
= control target key end

     0   :  { %s1729_s24 = smov 0   ;;  %s1731_s25 = smov 0   ;;  %s2284_s0 = inlined_call_operand.vmem [shape: f32[2,16,16,4], index: 0, kind: input, shape index: {}, may-alias: {0,1,2}]   ;;  %s2285_s1 = inlined_call_operand.vmem [shape: f32[2,16,16,4], index: 1, kind: input, shape index: {}, may-alias: {0,1,2}]   ;;  %s2286_s2 = inlined_call_operand.vmem [shape: f32[2,16,16,4], index: 2, kind: input, shape index: {}, may-alias: {0,1,2}]   ;;  %s2287_s3 = inlined_call_operand.vmem [shape: bf16[36,8], index: 3, kind: input, shape index: {}]   ;;  %s2288_s4 = inlined_call_operand.vmem [shape: f32[1,4], index: 4, kind: input, shape index: {}, may-alias: {4,5}]   ;;  %s2289_s5 = inlined_call_operand.vmem [shape: f32[1,4], index: 5, kind: input, shape index: {}, may-alias: {4,5}]   ;;  %s2290_s6 = inlined_call_operand.vmem [shape: f32[2,16,16,8], index: 6, kind: output, shape index: {0}]   ;;  %s2291_s7 = inlined_call_operand.vmem [shape: f32[2,2,2,8], index: 7, kind: output, shape index: {1}]  }
   0x1   :  { %s1733_s26 = smov 0   ;;  %s1735_s27 = smov 0  }
   0x2   :  { %s1737_s28 = smov 0  }
   0x3 LB: > { %s27_s4 = sadd.s32 1, %s1671_s26  ;;  %s30_s5 = sadd.s32 1, %s1675_s27  ;;  %s1679_s28 = sphi %s1737_s28, %s18_s28   ;;  %s1675_s27 = sphi %s1735_s27, %s2298_s27   ;;  %s1671_s26 = sphi %s1733_s26, %s2297_s26   ;;  %s1667_s25 = sphi %s1731_s25, %s2296_s25   ;;  %s1663_s24 = sphi %s1729_s24, %s2295_s24  }
   0x4   : > { %p28_p0 = scmp.ge.s32.totalorder %s27_s4, 2  ;;  %p1506_p1 = scmp.ge.s32.totalorder %s1679_s28, 1 }
   0x5   : > { %p328_p2 = scmp.lt.s32.totalorder %s1679_s28, 5 }
   0x6   : > { %s2300_s4 = smov (%p28_p0, %s27_s4), 0  ;;  %s2302_s5 = smov (!%p28_p0, %s30_s5), %s1675_s27 }
   0x7   : > { %p329_p3 = pnand %p1506_p1, %p328_p2  ;;  %p32_p4 = scmp.ge.s32.totalorder %s2302_s5, 2 }
   0x8   : > { %s1762_s29 = sshll.u32 (!%p329_p3), %s1663_s24, 3  ;;  %p405_p5 = scmp.lt.s32.totalorder (!%p329_p3), %s1667_s25, 1 }
   0x9   : > { %s2304_s5 = smov (%p32_p4, %s2302_s5), 0  ;;  %332 = sbr.rel (%p329_p3) target bundleno = 495 (0x1ef), region = 44 }
   0xa   : > { %p407_p6 = scmp.lt.s32.totalorder (!%p329_p3), %s1762_s29, 15  ;;  %s1512_s15 = sadd.s32 (!%p329_p3), 4294967295, %s1762_s29 }
   0xb   : > { %p417_p7 = scmp.gt.s32.totalorder (!%p329_p3), %s1512_s15, 0  ;;  %p1513_p8 = scmp.lt.s32.totalorder (!%p329_p3), %s1512_s15, 15 }
   0xc   : > { %p489_p9 = scmp.gt.s32.totalorder (!%p329_p3), %s1663_s24, 0  ;;  %s433_s18 = sadd.s32 (!%p329_p3), 8, %s1762_s29 }
   0xd   : > { %p1804_p10 = scmp.lt.s32.totalorder (!%p329_p3), %s433_s18, 15  ;;  %s1681_s23 = smov (!%p329_p3), 12  }
   0xe   : > { %s2306_s25 = smov (!%p405_p5, %s1667_s25), 1  ;;  %vm601_vm0 = vcmask 1040384   ;;  %vm602_vm1 = vsmask.f32 256  ;;  %vm737_vm3 = vcmask 1046528   ;;  %p462_p11 = scmp.lt.s32.totalorder %s1663_s24, 1 }
   0xf   : > { %s408_s30 = scalar_select %p407_p6, %s1762_s29, 15  ;;  %vm1794_vm2 = vmand %vm601_vm0, %vm602_vm1  ;;  %vm624_vm4 = vsmask.f32 7424  ;;  %vm1097_vm5 = vcmask 1041408   ;;  %vm924_vm6 = vcmask 31744   ;;  %vm941_vm7 = vcmask 64512  }
  0x10   : > { %s1769_s8 = sshll.u32 %s2306_s25, 5  ;;  %s2310_s18 = smov (!%p1804_p10, %s433_s18), 15  ;;  %vm958_vm8 = vcmask 97280   ;;  %vm975_vm9 = vcmask 130048   ;;  %vm992_vm10 = vcmask 162816   ;;  %vm1009_vm11 = vcmask 195584  }
  0x11   : > { %s1508_s9 = sshll.u32 %s408_s30, 1  ;;  %s2312_s18 = smov (!%p1804_p10, %s2310_s18), 15  ;;  %vm1026_vm12 = vcmask 228352   ;;  %vm1043_vm13 = vcmask 261120   ;;  %vm1080_vm14 = vcmask 293888   ;;  %vm1306_vm15 = vcmask 58368  }
  0x12   : > { %s1772_s10 = sadd.s32 %s1769_s8, %s1508_s9  ;;  %s1685_s21 = smov 4  }
  0x13   : > { %s1510_s11 = sshll.u32 %s1772_s10, 3 }
  0x14   : > { %s1780_s14 = scalar_lea.vmem %s2284_s0, %s1510_s11 }
  0x15   : > { %v471_v0 = vld [vmem:[%s1780_s14 + $0x10] sm:$0xff]  ;;  %v472_v1 = vld [vmem:[%s1780_s14 + $0x18] sm:$0xff]  ;;  %v469_v2 = vld [vmem:[%s1780_s14] sm:$0xff]  ;;  %s418_s16 = scalar_select %p417_p7, %s1512_s15, 0 }
  0x16   : > { %v503_v3 = vpack.c.bf16 %v472_v1, %v471_v0  ;;  %v470_v4 = vld [vmem:[%s1780_s14 + $0x8] sm:$0xff]  ;;  %v473_v5 = vld [vmem:[%s1780_s14 + $0x20] sm:$0xff]  ;;  %s1790_s17 = scalar_select %p489_p9, 1, 0  ;;  %v475_v35 = vld [vmem:[%s1780_s14 + $0x30] sm:$0xff] }
  0x17   : > { %v474_v6 = vld [vmem:[%s1780_s14 + $0x28] sm:$0xff]  ;;  %v502_v7 = vpack.c.bf16 %v470_v4, %v469_v2  ;;  %s2308_s16 = smov (!%p1513_p8, %s418_s16), 15  ;;  %s1532_s15 = sshll.u32 %s2306_s25, 1  ;;  %v476_v40 = vld [vmem:[%s1780_s14 + $0x38] sm:$0xff]  ;;  %v479_v45 = vld [vmem:[%s1780_s14 + $0x50] sm:$0xff] }
  0x18   : > { %v504_v8 = vpack.c.bf16 %v474_v6, %v473_v5  ;;  %v526_v9 = vshrl.u32 %v503_v3, 16  ;;  %v529_v10 = vshll.u32 %v503_v3, 16  ;;  %s1518_s19 = sshll.u32 %s2308_s16, 1  ;;  %s491_s13 = scvt.s32.f32 %s1790_s17  ;;  %v480_v46 = vld [vmem:[%s1780_s14 + $0x58] sm:$0xff]  ;;  %v1865_v54 = vpack.c.bf16 %v476_v40, %v475_v35  ;;  %v481_v60 = vld [vmem:[%s1780_s14 + $0x60] sm:$0xff]  ;;  %v482_v61 = vld [vmem:[%s1780_s14 + $0x68] sm:$0xff] }
  0x19   : > { %v519_v11 = vshrl.u32 %v502_v7, 16  ;;  %v522_v12 = vshll.u32 %v502_v7, 16  ;;  %s425_s20 = sadd.s32 %s1518_s19, %s1769_s8  ;;  %s1682_s16 = smov 24   ;;  %v507_v55 = vpack.c.bf16 %v480_v46, %v479_v45  ;;  %v508_v5 = vpack.c.bf16 %v482_v61, %v481_v60 }
  0x1a   : > { %v533_v13 = vshrl.u32 %v504_v8, 16  ;;  %v536_v14 = vshll.u32 %v504_v8, 16  ;;  %v528_v15 = vrot.slane %v526_v9, 7  ;;  %s1520_s22 = sshll.u32 %s425_s20, 3  ;;  %v492_v44 = vstv %s491_s13  ;;  %s1863_s17 = sshll.u32 %s2312_s18, 1 }
  0x1b   : > { %v521_v17 = vrot.slane %v519_v11, 7  ;;  %s427_s12 = scalar_lea.vmem %s2285_s1, %s1520_s22  ;;  %s442_s19 = sadd.s32 %s1863_s17, %s1769_s8  ;;  %v554_v4 = vshrl.u32 %v507_v55, 16  ;;  %v540_v6 = vshrl.u32 %v1865_v54, 16  ;;  %v477_v11 = vld [vmem:[%s1780_s14 + $0x40] sm:$0xff]  ;;  %v564_v35 = vshll.u32 %v508_v5, 16 }
  0x1c   : > { %v535_v18 = vrot.slane %v533_v13, 7  ;;  %v531_v19 = vor.u32 %v529_v10, %v528_v15  ;;  %v616_v26 = vsel %vm1794_vm2, %v528_v15, 0  ;;  %v485_v33 = vld [vmem:[%s427_s12] sm:$0xff]  ;;  %v486_v34 = vld [vmem:[%s427_s12 + $0x8] sm:$0xff]  ;;  %s463_s25 = scalar_select %p462_p11, %s1663_s24, 1 }
  0x1d   : > { %v524_v20 = vor.u32 %v522_v12, %v521_v17  ;;  %v615_v22 = vsel %vm1794_vm2, %v521_v17, 0  ;;  %v745_v37 = vrot.slane %v616_v26, 1  ;;  %v657_v39 = vshll.u32 %v616_v26, 16  ;;  %s1683_s20 = smov 8   ;;  %s1684_s18 = smov 20   ;;  %v478_v12 = vld [vmem:[%s1780_s14 + $0x48] sm:$0xff] }
  0x1e   : > { %v538_v21 = vor.u32 %v536_v14, %v535_v18  ;;  %v1810_v23 = vsel %vm1794_vm2, 0, %v531_v19  ;;  %v742_v25 = vrot.slane %v615_v22, 1  ;;  %v645_v31 = vshll.u32 %v615_v22, 16  ;;  %s1861_s29 = sadd.s32 %s1532_s15, %s463_s25  ;;  %s1686_s22 = smov 16  }
  0x1f   : > { %830 = vrot.lane.b32.xlu1 %v1810_v23, %s1681_s23  ;;  %v1816_v24 = vsel %vm1794_vm2, 0, %v524_v20  ;;  %v652_v32 = vshll.u32 %v1810_v23, 16  ;;  %v744_v36 = vrot.slane %v1810_v23, 1  ;;  %v650_v42 = vshrl.u32 %v1810_v23, 16  ;;  %s1527_s30 = sshll.u32 %s442_s19, 3  ;;  %s1687_s12 = smov 28  }
  0x20   : > { %828 = vrot.lane.b32.xlu0 %v1816_v24, %s1681_s23  ;;  %v1828_v27 = vsel %vm1794_vm2, 0, %v538_v21  ;;  %v741_v28 = vrot.slane %v1816_v24, 1  ;;  %v640_v29 = vshll.u32 %v1816_v24, 16  ;;  %v638_v30 = vshrl.u32 %v1816_v24, 16  ;;  %s1911_s9 = scalar_select %p462_p11, 1, 0 }
  0x21   : > { %v1852_v43 = vsel %vm1794_vm2, %v535_v18, 0  ;;  %v654_v47 = vrot.slane %v652_v32, 1  ;;  %v664_v48 = vshll.u32 %v1828_v27, 16  ;;  %v493_v49 = vmul.f32 %v492_v44, %v485_v33  ;;  %s444_s13 = scalar_lea.vmem %s2286_s2, %s1527_s30  ;;  %s1688_s15 = smov 32  }
  0x22   : > { %v642_v38 = vrot.slane %v640_v29, 1  ;;  %v743_v41 = vsel %vm737_vm3, %v741_v28, %v742_v25  ;;  %v494_v50 = vmul.f32 %v492_v44, %v486_v34  ;;  %v647_v52 = vrot.slane %v645_v31, 1  ;;  %s1533_s10 = sshll.u32 %s1861_s29, 1 }
  0x23   : > { %878 = vrot.lane.b32.xlu1 %v1828_v27, %s1682_s16  ;;  %v1871_v56 = vsel %vm737_vm3, %v744_v36, %v745_v37  ;;  %v659_v57 = vrot.slane %v657_v39, 1  ;;  %v662_v58 = vshrl.u32 %v1828_v27, 16  ;;  %v669_v59 = vshll.u32 %v1852_v43, 16  ;;  %v484_v39 = vld [vmem:[%s1780_s14 + $0x78] sm:$0xff] }
  0x24   : > { %876 = vrot.lane.b32.xlu0 %v1810_v23, %s1682_s16  ;;  %v643_v51 = vor.u32 %v642_v38, %v638_v30  ;;  %v501_v53 = vpack.c.bf16 %v494_v50, %v493_v49  ;;  %v655_v62 = vor.u32 %v654_v47, %v650_v42  ;;  %v666_v63 = vrot.slane %v664_v48, 1  ;;  %v483_v38 = vld [vmem:[%s1780_s14 + $0x70] sm:$0xff]  ;;  %s497_s14 = scvt.s32.f32 %s1911_s9 }
  0x25   : > { %v671_v9 = vrot.slane %v669_v59, 1  ;;  %v557_v14 = vshll.u32 %v507_v55, 16  ;;  %v556_v17 = vrot.slane %v554_v4, 7  ;;  %v561_v18 = vshrl.u32 %v508_v5, 16 }
  0x26   : > { %v512_v0 = vshrl.u32 %v501_v53, 16  ;;  %v515_v1 = vshll.u32 %v501_v53, 16  ;;  %v648_v2 = vsel %vm624_vm4, %v643_v51, %v647_v52  ;;  %v1884_v7 = vsel %vm624_vm4, %v655_v62, %v659_v57  ;;  %v488_v62 = vld [vmem:[%s444_s13 + $0x8] sm:$0xff] }
  0x27   : > { %814 = vrot.lane.b32.xlu1 %v743_v41, %s1683_s20  ;;  %v667_v8 = vor.u32 %v666_v63, %v662_v58  ;;  %v543_v20 = vshll.u32 %v1865_v54, 16  ;;  %v1898_v21 = vpack.c.bf16 %v478_v12, %v477_v11  ;;  %v542_v28 = vrot.slane %v540_v6, 7 }
  0x28   : > { %860 = vrot.lane.b32.xlu0 %v743_v41, %s1684_s18  ;;  %v514_v3 = vrot.slane %v512_v0, 7  ;;  %v559_v32 = vor.u32 %v557_v14, %v556_v17  ;;  %v1915_v33 = vsel %vm1794_vm2, %v556_v17, 0  ;;  %v563_v34 = vrot.slane %v561_v18, 7  ;;  %v1638_v17 = vld [vmem:[%s2287_s3 + $0x10] ss:$0 sps:$4 sm:$0x33]  }
  0x29   : > { %v1902_v22 = vsel %vm624_vm4, %v667_v8, %v671_v9  ;;  %v547_v36 = vshrl.u32 %v1898_v21, 16  ;;  %v747_v41 = vrot.slane %v1828_v27, 1  ;;  %v545_v42 = vor.u32 %v543_v20, %v542_v28  ;;  %1588 = vmatprep.subr.msk.bf16.mxu0 %vm1097_vm5, %v1638_v17  ;;  %1589 = vmatprep.subr.msk.bf16.mxu1 %vm1097_vm5, %v1638_v17 }
  0x2a   : > { %v517_v10 = vor.u32 %v515_v1, %v514_v3  ;;  %v614_v13 = vsel %vm1794_vm2, %v514_v3, 0  ;;  %v1922_v37 = vsel %vm1794_vm2, 0, %v559_v32  ;;  %v757_v47 = vrot.slane %v1915_v33, 1  ;;  %v1639_v32 = vld [vmem:[%s2287_s3 + $0x8] sm:$0xff]  }
  0x2b   : > { %862 = vrot.lane.b32.xlu1 %v1871_v56, %s1684_s18  ;;  %v739_v26 = vrot.slane %v614_v13, 1  ;;  %v633_v31 = vshll.u32 %v614_v13, 16  ;;  %v756_v44 = vrot.slane %v1922_v37, 1  ;;  %v566_v48 = vor.u32 %v564_v35, %v563_v34 }
  0x2c   : > { %798 = vrot.lane.b32.xlu0 %v648_v2, %s1685_s21  ;;  %v1892_v15 = vsel %vm1794_vm2, 0, %v517_v10  ;;  %v748_v49 = vrot.slane %v1852_v43, 1  ;;  %v1939_v50 = vsel %vm1794_vm2, %v542_v28, 0  ;;  %v621_v51 = vsel %vm1794_vm2, %v563_v34, 0  ;;  %v487_v43 = vld [vmem:[%s444_s13] sm:$0xff] }
  0x2d   : > { %v628_v19 = vshll.u32 %v1892_v15, 16  ;;  %v738_v25 = vrot.slane %v1892_v15, 1  ;;  %v626_v29 = vshrl.u32 %v1892_v15, 16  ;;  %v635_v46 = vrot.slane %v633_v31, 1 }
  0x2e   : > { %v509_v52 = vpack.c.bf16 %v484_v39, %v483_v38  ;;  %v1945_v53 = vsel %vm737_vm3, %v756_v44, %v757_v47  ;;  %v1949_v54 = vsel %vm1794_vm2, 0, %v566_v48  ;;  %v717_v55 = vshll.u32 %v621_v51, 16  ;;  %v1640_v48 = vld [vmem:[%s2287_s3] sm:$0xff]  }
  0x2f   : > { %846 = vrot.lane.b32.xlu1 %v1884_v7, %s1686_s22  ;;  %v630_v30 = vrot.slane %v628_v19, 1  ;;  %v740_v40 = vsel %vm737_vm3, %v738_v25, %v739_v26  ;;  %v760_v57 = vrot.slane %v621_v51, 1  ;;  %v1955_v58 = vsel %vm1794_vm2, 0, %v545_v42 }
  0x30   : > { %844 = vrot.lane.b32.xlu0 %v648_v2, %s1686_s22  ;;  %v710_v59 = vshrl.u32 %v1949_v54, 16  ;;  %v712_v60 = vshll.u32 %v1949_v54, 16  ;;  %v759_v61 = vrot.slane %v1949_v54, 1  ;;  %v568_v0 = vshrl.u32 %v509_v52, 16 }
  0x31   : > { %v631_v45 = vor.u32 %v630_v30, %v626_v29  ;;  %v571_v1 = vshll.u32 %v509_v52, 16  ;;  %v498_v2 = vstv %s497_s14  ;;  %v719_v4 = vrot.slane %v717_v55, 1 }
  0x32   : > { %v714_v3 = vrot.slane %v712_v60, 1  ;;  %v1962_v5 = vsel %vm737_vm3, %v759_v61, %v760_v57  ;;  %v499_v6 = vmul.f32 %v498_v2, %v487_v43  ;;  %v1967_v8 = vsel %vm737_vm3, %v747_v41, %v748_v49 }
  0x33   : > { %894 = vrot.lane.b32.xlu1 %v1902_v22, %s1687_s12  ;;  %v636_v63 = vsel %vm624_vm4, %v631_v45, %v635_v46  ;;  %v570_v9 = vrot.slane %v568_v0, 7  ;;  %v500_v10 = vmul.f32 %v498_v2, %v488_v62  ;;  %v676_v11 = vshll.u32 %v1955_v58, 16 }
  0x34   : > { %892 = vrot.lane.b32.xlu0 %v1884_v7, %s1687_s12  ;;  %v681_v12 = vshll.u32 %v1939_v50, 16  ;;  %v549_v13 = vrot.slane %v547_v36, 7  ;;  %v715_v14 = vor.u32 %v714_v3, %v710_v59  ;;  %v550_v18 = vshll.u32 %v1898_v21, 16 }
  0x35   : > { %v622_v19 = vsel %vm1794_vm2, %v570_v9, 0  ;;  %v510_v20 = vpack.c.bf16 %v500_v10, %v499_v6  ;;  %v674_v25 = vshrl.u32 %v1955_v58, 16  ;;  %v678_v34 = vrot.slane %v676_v11, 1 }
  0x36   : > { %v1980_v26 = vsel %vm624_vm4, %v715_v14, %v719_v4  ;;  %v770_v28 = vshll.u32 %v622_v19, 16  ;;  %v777_v29 = vrot.slane %v622_v19, 1  ;;  %v552_v39 = vor.u32 %v550_v18, %v549_v13 }
  0x37   : > { %812 = vrot.lane.b32.xlu1 %v740_v40, %s1683_s20  ;;  %v575_v21 = vshrl.u32 %v510_v20, 16  ;;  %v578_v31 = vshll.u32 %v510_v20, 16  ;;  %v1099_v41 = vsel %vm1097_vm5, %v1638_v17, 0  ;;  %v679_v49 = vor.u32 %v678_v34, %v674_v25 }
  0x38   : > { %908 = vrot.lane.b32.xlu0 %v1871_v56, %s1688_s15  ;;  %v772_v44 = vrot.slane %v770_v28, 1  ;;  %1561 = vmatpush3.bf16.msra.mxu0 %v1099_v41  ;;  %v683_v51 = vrot.slane %v681_v12, 1  ;;  %v2010_v57 = vsel %vm1794_vm2, 0, %v552_v39  ;;  %v750_v62 = vrot.slane %v1955_v58, 1 }
  0x39   : > { %v577_v40 = vrot.slane %v575_v21, 7  ;;  %1585 = vmatpush3.bf16.msra.mxu1 %v1099_v41  ;;  %1562 = vmatprep.subr.bf16.mxu0 %v1639_v32  ;;  %v688_v2 = vshll.u32 %v2010_v57, 16  ;;  %v619_v6 = vsel %vm1794_vm2, %v549_v13, 0  ;;  %v686_v11 = vshrl.u32 %v2010_v57, 16 }
  0x3a   : > { %1583 = vmatprep.subr.bf16.mxu1 %v1639_v32  ;;  %v693_v14 = vshll.u32 %v619_v6, 16  ;;  %v753_v18 = vrot.slane %v2010_v57, 1  ;;  %v698_v20 = vshrl.u32 %v1922_v37, 16  ;;  %v705_v28 = vshll.u32 %v1915_v33, 16 }
  0x3b   : > { %800 = vrot.lane.b32.xlu1 %v1884_v7, %s1685_s21  ;;  %v573_v7 = vor.u32 %v571_v1, %v570_v9  ;;  %v580_v46 = vor.u32 %v578_v31, %v577_v40  ;;  %v623_v47 = vsel %vm1794_vm2, %v577_v40, 0  ;;  %v684_v1 = vsel %vm624_vm4, %v679_v49, %v683_v51 }
  0x3c   : > { %796 = vrot.lane.b32.xlu0 %v636_v63, %s1685_s21  ;;  %v787_v55 = vshll.u32 %v623_v47, 16  ;;  %v794_v59 = vrot.slane %v623_v47, 1  ;;  %1563 = vmatpush3.bf16.msra.mxu0 %v1639_v32  ;;  %v751_v63 = vrot.slane %v1939_v50, 1  ;;  %v690_v12 = vrot.slane %v688_v2, 1 }
  0x3d   : > { %v1986_v30 = vsel %vm1794_vm2, 0, %v573_v7  ;;  %v2014_v43 = vsel %vm1794_vm2, 0, %v580_v46  ;;  %1586 = vmatpush3.bf16.msra.mxu1 %v1639_v32  ;;  %1564 = vmatprep.subr.bf16.mxu0 %v1640_v48  ;;  %v695_v17 = vrot.slane %v693_v14, 1  ;;  %v754_v7 = vrot.slane %v619_v6, 1 }
  0x3e   : > { %v763_v35 = vshrl.u32 %v1986_v30, 16  ;;  %v765_v36 = vshll.u32 %v1986_v30, 16  ;;  %v776_v38 = vrot.slane %v1986_v30, 1  ;;  %v780_v61 = vshrl.u32 %v2014_v43, 16  ;;  %1584 = vmatprep.subr.bf16.mxu1 %v1640_v48 }
  0x3f   : > { %802 = vrot.lane.b32.xlu1 %v1902_v22, %s1685_s21  ;;  %v793_v0 = vrot.slane %v2014_v43, 1  ;;  %v789_v4 = vrot.slane %v787_v55, 1  ;;  %v752_v10 = vsel %vm737_vm3, %v750_v62, %v751_v63  ;;  %v691_v13 = vor.u32 %v690_v12, %v686_v11 }
  0x40   : > { %910 = vrot.lane.b32.xlu0 %v1967_v8, %s1688_s15  ;;  %v767_v42 = vrot.slane %v765_v36, 1  ;;  %v1997_v45 = vsel %vm737_vm3, %v776_v38, %v777_v29  ;;  %1565 = vmatpush3.bf16.msra.mxu0 %v1640_v48  ;;  %v755_v19 = vsel %vm737_vm3, %v753_v18, %v754_v7  ;;  %v707_v21 = vrot.slane %v705_v28, 1 }
  0x41   : > { %v2033_v9 = vsel %vm737_vm3, %v793_v0, %v794_v59  ;;  %1587 = vmatpush3.bf16.msra.mxu1 %v1640_v48 }
  0x42   : > { %v768_v52 = vor.u32 %v767_v42, %v763_v35 }
  0x43   : > { %818 = vrot.lane.b32.xlu1 %v1967_v8, %s1683_s20 }
  0x44   : > { %816 = vrot.lane.b32.xlu0 %v1871_v56, %s1683_s20  ;;  %v2017_v60 = vsel %vm624_vm4, %v768_v52, %v772_v44  ;;  %v782_v56 = vshll.u32 %v2014_v43, 16 }
  0x46   : > { %v784_v3 = vrot.slane %v782_v56, 1 }
  0x47   : > { %834 = vrot.lane.b32.xlu1 %v1955_v58, %s1681_s23 }
  0x48   : > { %832 = vrot.lane.b32.xlu0 %v1828_v27, %s1681_s23  ;;  %v785_v50 = vor.u32 %v784_v3, %v780_v61 }
  0x4a   : > { %v790_v16 = vsel %vm624_vm4, %v785_v50, %v789_v4 }
  0x4b   : > { %850 = vrot.lane.b32.xlu1 %v684_v1, %s1686_s22 }
  0x4c   : > { %848 = vrot.lane.b32.xlu0 %v1902_v22, %s1686_s22  ;;  %v696_v22 = vsel %vm624_vm4, %v691_v13, %v695_v17 }
  0x4f   : > { %866 = vrot.lane.b32.xlu1 %v752_v10, %s1684_s18 }
  0x50   : > { %864 = vrot.lane.b32.xlu0 %v1967_v8, %s1684_s18  ;;  %v700_v8 = vshll.u32 %v1922_v37, 16 }
  0x52   : > { %v702_v25 = vrot.slane %v700_v8, 1 }
  0x53   : > { %882 = vrot.lane.b32.xlu1 %v2010_v57, %s1682_s16 }
  0x54   : > { %880 = vrot.lane.b32.xlu0 %v1955_v58, %s1682_s16  ;;  %v703_v29 = vor.u32 %v702_v25, %v698_v20 }
  0x56   : > { %v708_v31 = vsel %vm624_vm4, %v703_v29, %v707_v21 }
  0x57   : > { %898 = vrot.lane.b32.xlu1 %v696_v22, %s1687_s12 }
  0x58   : > { %896 = vrot.lane.b32.xlu0 %v684_v1, %s1687_s12 }
  0x5b   : > { %804 = vrot.lane.b32.xlu1 %v684_v1, %s1685_s21 }
  0x5c   : > { %912 = vrot.lane.b32.xlu0 %v752_v10, %s1688_s15 }
  0x5f   : > { %806 = vrot.lane.b32.xlu1 %v696_v22, %s1685_s21 }
  0x60   : > { %914 = vrot.lane.b32.xlu0 %v755_v19, %s1688_s15 }
  0x63   : > { %822 = vrot.lane.b32.xlu1 %v755_v19, %s1683_s20 }
  0x64   : > { %820 = vrot.lane.b32.xlu0 %v752_v10, %s1683_s20 }
  0x67   : > { %838 = vrot.lane.b32.xlu1 %v1922_v37, %s1681_s23 }
  0x68   : > { %836 = vrot.lane.b32.xlu0 %v2010_v57, %s1681_s23 }
  0x6b   : > { %854 = vrot.lane.b32.xlu1 %v708_v31, %s1686_s22 }
  0x6c   : > { %852 = vrot.lane.b32.xlu0 %v696_v22, %s1686_s22 }
  0x6f   : > { %870 = vrot.lane.b32.xlu1 %v1945_v53, %s1684_s18 }
  0x70   : > { %868 = vrot.lane.b32.xlu0 %v755_v19, %s1684_s18 }
  0x73   : > { %886 = vrot.lane.b32.xlu1 %v1949_v54, %s1682_s16 }
  0x74   : > { %884 = vrot.lane.b32.xlu0 %v1922_v37, %s1682_s16 }
  0x77   : > { %902 = vrot.lane.b32.xlu1 %v1980_v26, %s1687_s12 }
  0x78   : > { %900 = vrot.lane.b32.xlu0 %v708_v31, %s1687_s12 }
  0x7b   : > { %808 = vrot.lane.b32.xlu1 %v708_v31, %s1685_s21 }
  0x7c   : > { %916 = vrot.lane.b32.xlu0 %v1945_v53, %s1688_s15 }
  0x7f   : > { %810 = vrot.lane.b32.xlu1 %v1980_v26, %s1685_s21  ;;  %s467_s21 = scalar_lea.vmem %s2291_s7, %s1533_s10 }
  0x80   : > { %918 = vrot.lane.b32.xlu0 %v1962_v5, %s1688_s15 }
  0x83   : > { %826 = vrot.lane.b32.xlu1 %v1962_v5, %s1683_s20 }
  0x84   : > { %824 = vrot.lane.b32.xlu0 %v1945_v53, %s1683_s20  ;;  %s2198_s20 = scalar_lea.vmem %s2290_s6, %s1510_s11 }
  0x87   : > { %842 = vrot.lane.b32.xlu1 %v1986_v30, %s1681_s23 }
  0x88   : > { %840 = vrot.lane.b32.xlu0 %v1949_v54, %s1681_s23 }
  0x8b   : > { %858 = vrot.lane.b32.xlu1 %v2017_v60, %s1686_s22 }
  0x8c   : > { %856 = vrot.lane.b32.xlu0 %v1980_v26, %s1686_s22 }
  0x8f   : > { %874 = vrot.lane.b32.xlu1 %v1997_v45, %s1684_s18 }
  0x90   : > { %872 = vrot.lane.b32.xlu0 %v1962_v5, %s1684_s18 }
  0x91   : > { %v831_v33 = vpop.permute.xlu1 %830 }
  0x92   : > { %v829_v53 = vpop.permute.xlu0 %828 }
  0x93   : > { %890 = vrot.lane.b32.xlu1 %v2014_v43, %s1682_s16 }
  0x94   : > { %888 = vrot.lane.b32.xlu0 %v1986_v30, %s1682_s16 }
  0x95   : > { %v879_v32 = vpop.permute.xlu1 %878 }
  0x96   : > { %v877_v34 = vpop.permute.xlu0 %876 }
  0x97   : > { %906 = vrot.lane.b32.xlu1 %v790_v16, %s1687_s12 }
  0x98   : > { %904 = vrot.lane.b32.xlu0 %v2017_v60, %s1687_s12 }
  0x99   : > { %v815_v26 = vpop.permute.xlu1 %814 }
  0x9a   : > { %v861_v35 = vpop.permute.xlu0 %860 }
  0x9b   : > { %922 = vrot.lane.b32.xlu1 %v2033_v9, %s1688_s15 }
  0x9c   : > { %920 = vrot.lane.b32.xlu0 %v1997_v45, %s1688_s15 }
  0x9d   : > { %v863_v5 = vpop.permute.xlu1 %862 }
  0x9e   : > { %v799_v36 = vpop.permute.xlu0 %798 }
  0x9f   : > { %v928_v39 = vsel %vm924_vm6, %v1816_v24, %v799_v36 }
  0xa0   : > { %v945_v42 = vsel %vm941_vm7, %v928_v39, %v815_v26 }
  0xa1   : > { %v847_v38 = vpop.permute.xlu1 %846  ;;  %v962_v46 = vsel %vm958_vm8, %v945_v42, %v831_v33 }
  0xa2   : > { %v845_v30 = vpop.permute.xlu0 %844  ;;  %v979_v45 = vsel %vm975_vm9, %v962_v46, %v847_v38 }
  0xa3   : > { %v996_v24 = vsel %vm992_vm10, %v979_v45, %v863_v5 }
  0xa4   : > { %v1013_v61 = vsel %vm1009_vm11, %v996_v24, %v879_v32 }
  0xa5   : > { %v895_v40 = vpop.permute.xlu1 %894 }
  0xa6   : > { %v893_v41 = vpop.permute.xlu0 %892  ;;  %v1030_v0 = vsel %vm1026_vm12, %v1013_v61, %v895_v40 }
  0xa9   : > { %v813_v44 = vpop.permute.xlu1 %812 }
  0xaa   : > { %v909_v47 = vpop.permute.xlu0 %908 }
  0xad   : > { %v801_v48 = vpop.permute.xlu1 %800 }
  0xae   : > { %v797_v49 = vpop.permute.xlu0 %796  ;;  %v930_v16 = vsel %vm924_vm6, %v1810_v23, %v801_v48 }
  0xaf   : > { %v926_v51 = vsel %vm924_vm6, %v1892_v15, %v797_v49 }
  0xb0   : > { %v943_v52 = vsel %vm941_vm7, %v926_v51, %v813_v44 }
  0xb1   : > { %v960_v55 = vsel %vm958_vm8, %v943_v52, %v829_v53  ;;  %v803_v43 = vpop.permute.xlu1 %802 }
  0xb2   : > { %v977_v59 = vsel %vm975_vm9, %v960_v55, %v845_v30  ;;  %v911_v60 = vpop.permute.xlu0 %910  ;;  %v932_v8 = vsel %vm924_vm6, %v1828_v27, %v803_v43 }
  0xb3   : > { %v994_v56 = vsel %vm992_vm10, %v977_v59, %v861_v35  ;;  %v1047_v3 = vsel %vm1043_vm13, %v1030_v0, %v911_v60 }
  0xb4   : > { %v1011_v62 = vsel %vm1009_vm11, %v994_v56, %v877_v34 }
  0xb5   : > { %v819_v15 = vpop.permute.xlu1 %818  ;;  %v1028_v63 = vsel %vm1026_vm12, %v1011_v62, %v893_v41 }
  0xb6   : > { %v817_v1 = vpop.permute.xlu0 %816  ;;  %v1045_v2 = vsel %vm1043_vm13, %v1028_v63, %v909_v47  ;;  %v949_v20 = vsel %vm941_vm7, %v932_v8, %v819_v15 }
  0xb7   : > { %1566 = vmatprep.mubr.msk.bf16.mxu0 %vm1080_vm14, %v1045_v2  ;;  %v947_v13 = vsel %vm941_vm7, %v930_v16, %v817_v1 }
  0xb8   : > { %1567 = vmatmul.mubr.msk.bf16.vlgmr.msra.gmra.mxu0 %vm1080_vm14, %v1047_v3 }
  0xb9   : > { %v835_v4 = vpop.permute.xlu1 %834 }
  0xba   : > { %v833_v6 = vpop.permute.xlu0 %832  ;;  %v966_v23 = vsel %vm958_vm8, %v949_v20, %v835_v4 }
  0xbb   : > { %v964_v22 = vsel %vm958_vm8, %v947_v13, %v833_v6 }
  0xbd   : > { %v851_v9 = vpop.permute.xlu1 %850 }
  0xbe   : > { %v849_v50 = vpop.permute.xlu0 %848  ;;  %v983_v31 = vsel %vm975_vm9, %v966_v23, %v851_v9 }
  0xbf   : > { %v981_v7 = vsel %vm975_vm9, %v964_v22, %v849_v50 }
  0xc1   : > { %v867_v10 = vpop.permute.xlu1 %866 }
  0xc2   : > { %v865_v11 = vpop.permute.xlu0 %864  ;;  %v1000_v53 = vsel %vm992_vm10, %v983_v31, %v867_v10 }
  0xc3   : > { %v998_v19 = vsel %vm992_vm10, %v981_v7, %v865_v11 }
  0xc5   : > { %v883_v12 = vpop.permute.xlu1 %882 }
  0xc6   : > { %v881_v14 = vpop.permute.xlu0 %880  ;;  %v1017_v27 = vsel %vm1009_vm11, %v1000_v53, %v883_v12 }
  0xc7   : > { %v1015_v25 = vsel %vm1009_vm11, %v998_v19, %v881_v14 }
  0xc9   : > { %v899_v17 = vpop.permute.xlu1 %898 }
  0xca   : > { %v897_v18 = vpop.permute.xlu0 %896  ;;  %v1034_v34 = vsel %vm1026_vm12, %v1017_v27, %v899_v17 }
  0xcb   : > { %v1032_v29 = vsel %vm1026_vm12, %v1015_v25, %v897_v18 }
  0xcd   : > { %v805_v28 = vpop.permute.xlu1 %804 }
  0xce   : > { %v913_v21 = vpop.permute.xlu0 %912  ;;  %v934_v47 = vsel %vm924_vm6, %v1955_v58, %v805_v28 }
  0xcf   : > { %v1049_v33 = vsel %vm1043_vm13, %v1032_v29, %v913_v21 }
  0xd0   : > { %1570 = vmatprep.mubr.msk.bf16.mxu0 %vm1080_vm14, %v1049_v33 }
  0xd1   : > { %v807_v32 = vpop.permute.xlu1 %806 }
  0xd2   : > { %v915_v26 = vpop.permute.xlu0 %914  ;;  %v936_v52 = vsel %vm924_vm6, %v2010_v57, %v807_v32 }
  0xd3   : > { %v1051_v35 = vsel %vm1043_vm13, %v1034_v34, %v915_v26 }
  0xd4   : > { %1571 = vmatmul.mubr.msk.bf16.gmra.mxu0 %vm1080_vm14, %v1051_v35 }
  0xd5   : > { %v823_v5 = vpop.permute.xlu1 %822 }
  0xd6   : > { %v821_v36 = vpop.permute.xlu0 %820  ;;  %v953_v43 = vsel %vm941_vm7, %v936_v52, %v823_v5 }
  0xd7   : > { %v951_v45 = vsel %vm941_vm7, %v934_v47, %v821_v36 }
  0xd9   : > { %v839_v38 = vpop.permute.xlu1 %838 }
  0xda   : > { %v837_v30 = vpop.permute.xlu0 %836  ;;  %v970_v58 = vsel %vm958_vm8, %v953_v43, %v839_v38 }
  0xdb   : > { %v968_v49 = vsel %vm958_vm8, %v951_v45, %v837_v30 }
  0xdd   : > { %v855_v39 = vpop.permute.xlu1 %854 }
  0xde   : > { %v853_v40 = vpop.permute.xlu0 %852  ;;  %v987_v62 = vsel %vm975_vm9, %v970_v58, %v855_v39 }
  0xdf   : > { %v985_v24 = vsel %vm975_vm9, %v968_v49, %v853_v40 }
  0xe1   : > { %v871_v41 = vpop.permute.xlu1 %870 }
  0xe2   : > { %v869_v42 = vpop.permute.xlu0 %868  ;;  %v1004_v63 = vsel %vm992_vm10, %v987_v62, %v871_v41 }
  0xe3   : > { %v1002_v55 = vsel %vm992_vm10, %v985_v24, %v869_v42 }
  0xe5   : > { %v887_v44 = vpop.permute.xlu1 %886 }
  0xe6   : > { %v885_v46 = vpop.permute.xlu0 %884  ;;  %v1021_v57 = vsel %vm1009_vm11, %v1004_v63, %v887_v44 }
  0xe7   : > { %v1019_v59 = vsel %vm1009_vm11, %v1002_v55, %v885_v46 }
  0xe9   : > { %v903_v48 = vpop.permute.xlu1 %902 }
  0xea   : > { %v901_v51 = vpop.permute.xlu0 %900  ;;  %v1038_v1 = vsel %vm1026_vm12, %v1021_v57, %v903_v48 }
  0xeb   : > { %v1036_v61 = vsel %vm1026_vm12, %v1019_v59, %v901_v51 }
  0xed   : > { %v809_v60 = vpop.permute.xlu1 %808 }
  0xee   : > { %v917_v56 = vpop.permute.xlu0 %916  ;;  %v938_v22 = vsel %vm924_vm6, %v1922_v37, %v809_v60 }
  0xef   : > { %v1053_v15 = vsel %vm1043_vm13, %v1036_v61, %v917_v56 }
  0xf0   : > { %1574 = vmatprep.mubr.msk.bf16.mxu1 %vm1080_vm14, %v1053_v15 }
  0xf1   : > { %v811_v0 = vpop.permute.xlu1 %810 }
  0xf2   : > { %v919_v2 = vpop.permute.xlu0 %918  ;;  %v940_v17 = vsel %vm924_vm6, %v1949_v54, %v811_v0 }
  0xf3   : > { %v1055_v3 = vsel %vm1043_vm13, %v1038_v1, %v919_v2 }
  0xf4   : > { %1575 = vmatmul.mubr.msk.bf16.vlgmr.msra.gmra.mxu1 %vm1080_vm14, %v1055_v3 }
  0xf5   : > { %v827_v4 = vpop.permute.xlu1 %826 }
  0xf6   : > { %v825_v6 = vpop.permute.xlu0 %824  ;;  %v957_v18 = vsel %vm941_vm7, %v940_v17, %v827_v4 }
  0xf7   : > { %v955_v7 = vsel %vm941_vm7, %v938_v22, %v825_v6 }
  0xf9   : > { %v843_v9 = vpop.permute.xlu1 %842 }
  0xfa   : > { %v841_v50 = vpop.permute.xlu0 %840  ;;  %v974_v8 = vsel %vm958_vm8, %v957_v18, %v843_v9 }
  0xfb   : > { %v972_v20 = vsel %vm958_vm8, %v955_v7, %v841_v50 }
  0xfd   : > { %v859_v10 = vpop.permute.xlu1 %858 }
  0xfe   : > { %v857_v11 = vpop.permute.xlu0 %856  ;;  %v991_v25 = vsel %vm975_vm9, %v974_v8, %v859_v10 }
  0xff   : > { %v989_v23 = vsel %vm975_vm9, %v972_v20, %v857_v11 }
 0x101   : > { %v875_v12 = vpop.permute.xlu1 %874 }
 0x102   : > { %v873_v14 = vpop.permute.xlu0 %872  ;;  %v1008_v54 = vsel %vm992_vm10, %v991_v25, %v875_v12 }
 0x103   : > { %v1006_v29 = vsel %vm992_vm10, %v989_v23, %v873_v14 }
 0x105   : > { %v891_v16 = vpop.permute.xlu1 %890 }
 0x106   : > { %v889_v13 = vpop.permute.xlu0 %888  ;;  %v1025_v37 = vsel %vm1009_vm11, %v1008_v54, %v891_v16 }
 0x107   : > { %v1023_v21 = vsel %vm1009_vm11, %v1006_v29, %v889_v13 }
 0x109   : > { %v907_v19 = vpop.permute.xlu1 %906 }
 0x10a   : > { %v905_v28 = vpop.permute.xlu0 %904  ;;  %v1042_v31 = vsel %vm1026_vm12, %v1025_v37, %v907_v19 }
 0x10b   : > { %v1040_v53 = vsel %vm1026_vm12, %v1023_v21, %v905_v28 }
 0x10d   : > { %v923_v33 = vpop.permute.xlu1 %922 }
 0x10e   : > { %v1059_v27 = vsel %vm1043_vm13, %v1042_v31, %v923_v33  ;;  %v921_v32 = vpop.permute.xlu0 %920 }
 0x10f   : > { %v1057_v34 = vsel %vm1043_vm13, %v1040_v53, %v921_v32 }
 0x110   : > { %1578 = vmatprep.mubr.msk.bf16.mxu1 %vm1080_vm14, %v1057_v34 }
 0x111   : > { %1579 = vmatmul.mubr.msk.bf16.gmra.mxu1 %vm1080_vm14, %v1059_v27 }
 0x178   : > { %v1568_v26 = vpop.f32.mrf.mxu0 }
 0x179   : > { %1200 = vst.msk [vmem:[%s2198_s20 + $0x10] sm:$0xff] %vm941_vm7, %v1568_v26  ;;  %v1253_v30 = vmul.f32 %v1568_v26, %v1568_v26  ;;  %v1217_v44 = vsel %vm941_vm7, %v1568_v26, 0.0 }
 0x17a   : > { %v1135_v35 = vpop.f32.mrf.mxu0 }
 0x17b   : > { %1198 = vst.msk [vmem:[%s2198_s20] sm:$0xff] %vm941_vm7, %v1135_v35  ;;  %v1251_v36 = vmul.f32 %v1135_v35, %v1135_v35  ;;  %v1214_v39 = vsel %vm941_vm7, %v1135_v35, 0.0  ;;  %v1270_v51 = vsel %vm941_vm7, %v1253_v30, 0.0 }
 0x17c   : > { %v1569_v5 = vpop.f32.mrf.mxu0 }
 0x17d   : > { %1201 = vst.msk [vmem:[%s2198_s20 + $0x18] sm:$0xff] %vm941_vm7, %v1569_v5  ;;  %v1267_v46 = vsel %vm941_vm7, %v1251_v36, 0.0  ;;  %v1254_v47 = vmul.f32 %v1569_v5, %v1569_v5  ;;  %v1219_v24 = vsel %vm941_vm7, %v1569_v5, 0.0 }
 0x17e   : > { %v1138_v38 = vpop.f32.mrf.mxu0 }
 0x17f   : > { %1199 = vst.msk [vmem:[%s2198_s20 + $0x8] sm:$0xff] %vm941_vm7, %v1138_v38  ;;  %v1215_v40 = vsel %vm941_vm7, %v1138_v38, 0.0  ;;  %v1252_v41 = vmul.f32 %v1138_v38, %v1138_v38  ;;  %v1272_v43 = vsel %vm941_vm7, %v1254_v47, 0.0 }
 0x180   : > { %v1216_v42 = vadd.f32 %v1215_v40, %v1214_v39 }
 0x181   : > { %v1268_v45 = vsel %vm941_vm7, %v1252_v41, 0.0 }
 0x182   : > { %v1218_v48 = vadd.f32 %v1217_v44, %v1216_v42  ;;  %v1269_v49 = vadd.f32 %v1268_v45, %v1267_v46 }
 0x184   : > { %v1271_v52 = vadd.f32 %v1270_v51, %v1269_v49  ;;  %v1220_v55 = vadd.f32 %v1219_v24, %v1218_v48 }
 0x186   : > { %v1273_v59 = vadd.f32 %v1272_v43, %v1271_v52 }
 0x194   : > { %v1572_v60 = vpop.f32.mrf.mxu0 }
 0x195   : > { %1204 = vst.msk [vmem:[%s2198_s20 + $0x30] sm:$0xff] %vm941_vm7, %v1572_v60  ;;  %v1257_v11 = vmul.f32 %v1572_v60, %v1572_v60  ;;  %v1225_v14 = vsel %vm941_vm7, %v1572_v60, 0.0 }
 0x196   : > { %v1151_v58 = vpop.f32.mrf.mxu0 }
 0x197   : > { %1202 = vst.msk [vmem:[%s2198_s20 + $0x20] sm:$0xff] %vm941_vm7, %v1151_v58  ;;  %v1255_v57 = vmul.f32 %v1151_v58, %v1151_v58  ;;  %v1221_v1 = vsel %vm941_vm7, %v1151_v58, 0.0  ;;  %v1278_v13 = vsel %vm941_vm7, %v1257_v11, 0.0 }
 0x198   : > { %v1573_v61 = vpop.f32.mrf.mxu0  ;;  %v1222_v6 = vadd.f32 %v1221_v1, %v1220_v55 }
 0x199   : > { %1205 = vst.msk [vmem:[%s2198_s20 + $0x38] sm:$0xff] %vm941_vm7, %v1573_v61  ;;  %v1274_v3 = vsel %vm941_vm7, %v1255_v57, 0.0  ;;  %v1258_v17 = vmul.f32 %v1573_v61, %v1573_v61  ;;  %v1227_v7 = vsel %vm941_vm7, %v1573_v61, 0.0 }
 0x19a   : > { %v1154_v56 = vpop.f32.mrf.mxu0  ;;  %v1275_v50 = vadd.f32 %v1274_v3, %v1273_v59 }
 0x19b   : > { %1203 = vst.msk [vmem:[%s2198_s20 + $0x28] sm:$0xff] %vm941_vm7, %v1154_v56  ;;  %v1256_v2 = vmul.f32 %v1154_v56, %v1154_v56  ;;  %v1223_v4 = vsel %vm941_vm7, %v1154_v56, 0.0  ;;  %v1280_v25 = vsel %vm941_vm7, %v1258_v17, 0.0 }
 0x19c   : > { %v1224_v10 = vadd.f32 %v1223_v4, %v1222_v6 }
 0x19d   : > { %v1276_v9 = vsel %vm941_vm7, %v1256_v2, 0.0 }
 0x19e   : > { %v1277_v12 = vadd.f32 %v1276_v9, %v1275_v50  ;;  %v1226_v16 = vadd.f32 %v1225_v14, %v1224_v10 }
 0x1a0   : > { %v1279_v18 = vadd.f32 %v1278_v13, %v1277_v12  ;;  %v1228_v20 = vadd.f32 %v1227_v7, %v1226_v16 }
 0x1a2   : > { %v1281_v29 = vadd.f32 %v1280_v25, %v1279_v18 }
 0x1b4   : > { %v1576_v62 = vpop.f32.mrf.mxu1 }
 0x1b5   : > { %1208 = vst.msk [vmem:[%s2198_s20 + $0x50] sm:$0xff] %vm941_vm7, %v1576_v62  ;;  %v1261_v33 = vmul.f32 %v1576_v62, %v1576_v62  ;;  %v1233_v27 = vsel %vm941_vm7, %v1576_v62, 0.0 }
 0x1b6   : > { %v1167_v15 = vpop.f32.mrf.mxu1 }
 0x1b7   : > { %1206 = vst.msk [vmem:[%s2198_s20 + $0x40] sm:$0xff] %vm941_vm7, %v1167_v15  ;;  %v1259_v22 = vmul.f32 %v1167_v15, %v1167_v15  ;;  %v1229_v8 = vsel %vm941_vm7, %v1167_v15, 0.0  ;;  %v1286_v26 = vsel %vm941_vm7, %v1261_v33, 0.0 }
 0x1b8   : > { %v1577_v63 = vpop.f32.mrf.mxu1  ;;  %v1230_v54 = vadd.f32 %v1229_v8, %v1228_v20 }
 0x1b9   : > { %1209 = vst.msk [vmem:[%s2198_s20 + $0x58] sm:$0xff] %vm941_vm7, %v1577_v63  ;;  %v1282_v28 = vsel %vm941_vm7, %v1259_v22, 0.0  ;;  %v1262_v35 = vmul.f32 %v1577_v63, %v1577_v63  ;;  %v1235_v38 = vsel %vm941_vm7, %v1577_v63, 0.0 }
 0x1ba   : > { %v1170_v0 = vpop.f32.mrf.mxu1  ;;  %v1283_v21 = vadd.f32 %v1282_v28, %v1281_v29 }
 0x1bb   : > { %1207 = vst.msk [vmem:[%s2198_s20 + $0x48] sm:$0xff] %vm941_vm7, %v1170_v0  ;;  %v1260_v19 = vmul.f32 %v1170_v0, %v1170_v0  ;;  %v1231_v23 = vsel %vm941_vm7, %v1170_v0, 0.0  ;;  %v1288_v42 = vsel %vm941_vm7, %v1262_v35, 0.0 }
 0x1bc   : > { %v1232_v31 = vadd.f32 %v1231_v23, %v1230_v54 }
 0x1bd   : > { %v1284_v37 = vsel %vm941_vm7, %v1260_v19, 0.0 }
 0x1be   : > { %v1285_v53 = vadd.f32 %v1284_v37, %v1283_v21  ;;  %v1234_v32 = vadd.f32 %v1233_v27, %v1232_v31 }
 0x1c0   : > { %v1287_v5 = vadd.f32 %v1286_v26, %v1285_v53  ;;  %v1236_v40 = vadd.f32 %v1235_v38, %v1234_v32 }
 0x1c2   : > { %v1289_v47 = vadd.f32 %v1288_v42, %v1287_v5 }
 0x1d1   : > { %v1580_v34 = vpop.f32.mrf.mxu1 }
 0x1d2   : > { %1212 = vst.msk [vmem:[%s2198_s20 + $0x70] sm:$0xff] %vm941_vm7, %v1580_v34  ;;  %v1265_v48 = vmul.f32 %v1580_v34, %v1580_v34  ;;  %v1241_v55 = vsel %vm941_vm7, %v1580_v34, 0.0 }
 0x1d3   : > { %v1183_v36 = vpop.f32.mrf.mxu1 }
 0x1d4   : > { %1210 = vst.msk [vmem:[%s2198_s20 + $0x60] sm:$0xff] %vm941_vm7, %v1183_v36  ;;  %v1237_v30 = vsel %vm941_vm7, %v1183_v36, 0.0  ;;  %v1263_v39 = vmul.f32 %v1183_v36, %v1183_v36  ;;  %v1294_v61 = vsel %vm941_vm7, %v1265_v48, 0.0 }
 0x1d5   : > { %v1581_v41 = vpop.f32.mrf.mxu1  ;;  %v1238_v46 = vadd.f32 %v1237_v30, %v1236_v40 }
 0x1d6   : > { %v1290_v44 = vsel %vm941_vm7, %v1263_v39, 0.0  ;;  %1213 = vst.msk [vmem:[%s2198_s20 + $0x78] sm:$0xff] %vm941_vm7, %v1581_v41  ;;  %v1266_v43 = vmul.f32 %v1581_v41, %v1581_v41  ;;  %v1243_v56 = vsel %vm941_vm7, %v1581_v41, 0.0 }
 0x1d7   : > { %v1186_v45 = vpop.f32.mrf.mxu1  ;;  %v1291_v24 = vadd.f32 %v1290_v44, %v1289_v47 }
 0x1d8   : > { %1211 = vst.msk [vmem:[%s2198_s20 + $0x68] sm:$0xff] %vm941_vm7, %v1186_v45  ;;  %v1239_v49 = vsel %vm941_vm7, %v1186_v45, 0.0  ;;  %v1264_v51 = vmul.f32 %v1186_v45, %v1186_v45  ;;  %v1296_v63 = vsel %vm941_vm7, %v1266_v43, 0.0 }
 0x1d9   : > { %v1240_v52 = vadd.f32 %v1239_v49, %v1238_v46 }
 0x1da   : > { %v1292_v59 = vsel %vm941_vm7, %v1264_v51, 0.0 }
 0x1db   : > { %v1242_v60 = vadd.f32 %v1241_v55, %v1240_v52  ;;  %v1293_v58 = vadd.f32 %v1292_v59, %v1291_v24 }
 0x1dd   : > { %v1244_v62 = vadd.f32 %v1243_v56, %v1242_v60  ;;  %v1295_v15 = vadd.f32 %v1294_v61, %v1293_v58 }
 0x1df   : > { %v1245_v57 = vrot.slane %v1244_v62, 4  ;;  %v1297_v0 = vadd.f32 %v1296_v63, %v1295_v15 }
 0x1e1   : > { %v1246_v1 = vadd.f32 %v1245_v57, %v1244_v62  ;;  %v1298_v2 = vrot.slane %v1297_v0, 4 }
 0x1e3   : > { %v1247_v3 = vrot.slane %v1246_v1, 2  ;;  %v1299_v4 = vadd.f32 %v1298_v2, %v1297_v0 }
 0x1e5   : > { %v1248_v6 = vadd.f32 %v1247_v3, %v1246_v1  ;;  %v1300_v9 = vrot.slane %v1299_v4, 2 }
 0x1e7   : > { %v1249_v50 = vrot.slane %v1248_v6, 1  ;;  %v1301_v10 = vadd.f32 %v1300_v9, %v1299_v4 }
 0x1e9   : > { %v1302_v11 = vrot.slane %v1301_v10, 1  ;;  %v1250_v12 = vadd.f32 %v1249_v50, %v1248_v6 }
 0x1eb   : > { %v1303_v14 = vadd.f32 %v1302_v11, %v1301_v10 }
 0x1ed   : > { %v1305_v16 = vsel %vm601_vm0, %v1250_v12, %v1303_v14 }
 0x1ee   : > { %1307 = vst.msk [vmem:[%s467_s21] sm:$0x3] %vm1306_vm15, %v1305_v16 }
 0x1ef PF: > { %s18_s28 = sadd.s32 1, %s1679_s28   ;;  %s2295_s24 = smov %s1671_s26 }
 0x1f0   : > { %p15_p12 = scmp.ge.s32.totalorder %s18_s28, 6   ;;  %s2296_s25 = smov %s1675_s27 }
 0x1f1   : > { %s2297_s26 = smov %s2300_s4  ;;  %s2298_s27 = smov %s2304_s5 }
 0x1f2   :  { %17 = sbr.rel (!%p15_p12) target bundleno = 3 (0x3), region = 92 }

// kernel: double_conv.4
= control target key start
LH: loop header
LB: loop body
LE: loop exit
PB: predicated region body
PF: predicated region fallthrough
CT: control target
= control target key end

     0   :  { %s1835_s24 = smov 0   ;;  %s1837_s25 = smov 0   ;;  %s2473_s0 = inlined_call_operand.vmem [shape: f32[2,16,16,8], index: 0, kind: input, shape index: {}, may-alias: {0,1,2}]   ;;  %s2474_s1 = inlined_call_operand.vmem [shape: f32[2,16,16,8], index: 1, kind: input, shape index: {}, may-alias: {0,1,2}]   ;;  %s2475_s2 = inlined_call_operand.vmem [shape: f32[2,16,16,8], index: 2, kind: input, shape index: {}, may-alias: {0,1,2}]   ;;  %s2476_s3 = inlined_call_operand.vmem [shape: bf16[72,8], index: 3, kind: input, shape index: {}]   ;;  %s2477_s4 = inlined_call_operand.vmem [shape: f32[1,8], index: 4, kind: input, shape index: {}]   ;;  %s2478_s5 = inlined_call_operand.vmem [shape: f32[1,8], index: 5, kind: input, shape index: {}]   ;;  %s2479_s6 = inlined_call_operand.vmem [shape: f32[2,16,16,8], index: 6, kind: output, shape index: {0}]   ;;  %s2480_s7 = inlined_call_operand.vmem [shape: f32[2,2,2,8], index: 7, kind: output, shape index: {1}]  }
   0x1   :  { %s1839_s26 = smov 0   ;;  %s1841_s27 = smov 0  }
   0x2   :  { %s1843_s28 = smov 0  }
   0x3 LB: > { %s27_s29 = sadd.s32 1, %s1777_s26  ;;  %s30_s30 = sadd.s32 1, %s1781_s27  ;;  %s1785_s28 = sphi %s1843_s28, %s18_s28   ;;  %s1781_s27 = sphi %s1841_s27, %s2487_s27   ;;  %s1777_s26 = sphi %s1839_s26, %s2486_s26   ;;  %s1773_s25 = sphi %s1837_s25, %s2485_s25   ;;  %s1769_s24 = sphi %s1835_s24, %s2484_s24  }
   0x4   : > { %p28_p0 = scmp.ge.s32.totalorder %s27_s29, 2  ;;  %p1596_p1 = scmp.ge.s32.totalorder %s1785_s28, 1 }
   0x5   : > { %p328_p2 = scmp.lt.s32.totalorder %s1785_s28, 5 }
   0x6   : > { %s2489_s29 = smov (%p28_p0, %s27_s29), 0  ;;  %s2491_s30 = smov (!%p28_p0, %s30_s30), %s1781_s27 }
   0x7   : > { %p329_p3 = pnand %p1596_p1, %p328_p2  ;;  %p32_p4 = scmp.ge.s32.totalorder %s2491_s30, 2 }
   0x8   : > { %s1868_s8 = sshll.u32 (!%p329_p3), %s1769_s24, 3  ;;  %p405_p5 = scmp.lt.s32.totalorder (!%p329_p3), %s1773_s25, 1 }
   0x9   : > { %s2493_s30 = smov (%p32_p4, %s2491_s30), 0  ;;  %332 = sbr.rel (%p329_p3) target bundleno = 501 (0x1f5), region = 44 }
   0xa   : > { %p407_p6 = scmp.lt.s32.totalorder (!%p329_p3), %s1868_s8, 15  ;;  %s1602_s21 = sadd.s32 (!%p329_p3), 4294967295, %s1868_s8 }
   0xb   : > { %p563_p7 = scmp.gt.s32.totalorder (!%p329_p3), %s1769_s24, 0  ;;  %p417_p8 = scmp.gt.s32.totalorder (!%p329_p3), %s1602_s21, 0 }
   0xc   : > { %p1603_p9 = scmp.lt.s32.totalorder (!%p329_p3), %s1602_s21, 15  ;;  %p462_p11 = scmp.lt.s32.totalorder (!%p329_p3), %s1769_s24, 1 }
   0xd   : > { %s1792_s19 = smov (!%p329_p3), 32  }
   0xe   : > { %s2495_s25 = smov (!%p405_p5, %s1773_s25), 1  ;;  %v1884_v0 = vld [vmem:[%s2477_s4] ss:$0 sm:$0xff]  ;;  %vm675_vm0 = vcmask 1040384   ;;  %vm676_vm1 = vsmask.f32 256 }
   0xf   : > { %s408_s9 = scalar_select %p407_p6, %s1868_s8, 15  ;;  %v1896_v1 = vld [vmem:[%s2478_s5] ss:$0 sm:$0xff]  ;;  %vm1946_vm2 = vmand %vm675_vm0, %vm676_vm1  ;;  %vm811_vm3 = vcmask 1046528   ;;  %vm698_vm4 = vsmask.f32 7424 }
  0x10   : > { %s1875_s10 = sshll.u32 %s2495_s25, 5  ;;  %vm1187_vm5 = vcmask 1043456   ;;  %vm998_vm6 = vcmask 64512   ;;  %vm1015_vm7 = vcmask 130048   ;;  %vm1032_vm8 = vcmask 195584  }
  0x11   : > { %s1598_s11 = sshll.u32 %s408_s9, 1  ;;  %s433_s9 = sadd.s32 8, %s1868_s8  ;;  %vm1049_vm9 = vcmask 261120   ;;  %vm1066_vm10 = vcmask 326656   ;;  %vm1083_vm11 = vcmask 392192   ;;  %vm1100_vm12 = vcmask 457728  }
  0x12   : > { %s1878_s12 = sadd.s32 %s1875_s10, %s1598_s11  ;;  %p1929_p10 = scmp.lt.s32.totalorder %s433_s9, 15  ;;  %vm1117_vm13 = vcmask 523264   ;;  %vm1170_vm14 = vcmask 588800   ;;  %vm1396_vm15 = vcmask 58368  }
  0x13   : > { %s1600_s13 = sshll.u32 %s1878_s12, 3 }
  0x14   : > { %s1891_s18 = scalar_lea.vmem %s2473_s0, %s1600_s13  ;;  %s2499_s9 = smov (!%p1929_p10, %s433_s9), 15 }
  0x15   : > { %v471_v2 = vld [vmem:[%s1891_s18 + $0x10] sm:$0xff]  ;;  %v472_v3 = vld [vmem:[%s1891_s18 + $0x18] sm:$0xff]  ;;  %v469_v4 = vld [vmem:[%s1891_s18] sm:$0xff]  ;;  %s1915_s22 = scalar_select %p563_p7, 1, 0 }
  0x16   : > { %v499_v5 = vmul.f32 %v1884_v0, %v471_v2  ;;  %v500_v6 = vmul.f32 %v1884_v0, %v472_v3  ;;  %v470_v7 = vld [vmem:[%s1891_s18 + $0x8] sm:$0xff]  ;;  %v497_v8 = vmul.f32 %v1884_v0, %v469_v4  ;;  %v473_v9 = vld [vmem:[%s1891_s18 + $0x20] sm:$0xff]  ;;  %s418_s23 = scalar_select %p417_p8, %s1602_s21, 0  ;;  %v475_v20 = vld [vmem:[%s1891_s18 + $0x30] sm:$0xff] }
  0x17   : > { %v474_v10 = vld [vmem:[%s1891_s18 + $0x28] sm:$0xff]  ;;  %v498_v11 = vmul.f32 %v1884_v0, %v470_v7  ;;  %v501_v12 = vmul.f32 %v1884_v0, %v473_v9  ;;  %v476_v21 = vld [vmem:[%s1891_s18 + $0x38] sm:$0xff]  ;;  %v479_v28 = vld [vmem:[%s1891_s18 + $0x50] sm:$0xff]  ;;  %v503_v30 = vmul.f32 %v1884_v0, %v475_v20  ;;  %s565_s16 = scvt.s32.f32 %s1915_s22  ;;  %s2501_s9 = smov (!%p1929_p10, %s2499_s9), 15 }
  0x18   : > { %v502_v13 = vmul.f32 %v1884_v0, %v474_v10  ;;  %v521_v14 = vadd.f32 %v1896_v1, %v499_v5  ;;  %v522_v15 = vadd.f32 %v1896_v1, %v500_v6  ;;  %v519_v16 = vadd.f32 %v1896_v1, %v497_v8  ;;  %s2497_s23 = smov (!%p1603_p9, %s418_s23), 15  ;;  %v480_v36 = vld [vmem:[%s1891_s18 + $0x58] sm:$0xff]  ;;  %v477_v48 = vld [vmem:[%s1891_s18 + $0x40] sm:$0xff]  ;;  %v478_v60 = vld [vmem:[%s1891_s18 + $0x48] sm:$0xff]  ;;  %s1988_s14 = sshll.u32 %s2501_s9, 1 }
  0x19   : > { %v520_v17 = vadd.f32 %v1896_v1, %v498_v11  ;;  %v523_v18 = vadd.f32 %v1896_v1, %v501_v12  ;;  %v504_v31 = vmul.f32 %v1884_v0, %v476_v21  ;;  %s1608_s11 = sshll.u32 %s2497_s23, 1  ;;  %v507_v37 = vmul.f32 %v1884_v0, %v479_v28  ;;  %s1622_s23 = sshll.u32 %s2495_s25, 1 }
  0x1a   : > { %v524_v19 = vadd.f32 %v1896_v1, %v502_v13  ;;  %v537_v22 = vmax.f32 %v521_v14, 0.0  ;;  %v538_v23 = vmax.f32 %v522_v15, 0.0  ;;  %v535_v24 = vmax.f32 %v519_v16, 0.0  ;;  %s425_s15 = sadd.s32 %s1608_s11, %s1875_s10  ;;  %s1787_s11 = smov 24  }
  0x1b   : > { %v536_v25 = vmax.f32 %v520_v17, 0.0  ;;  %v539_v26 = vmax.f32 %v523_v18, 0.0  ;;  %s1610_s17 = sshll.u32 %s425_s15, 3  ;;  %v525_v43 = vadd.f32 %v1896_v1, %v503_v30  ;;  %v526_v44 = vadd.f32 %v1896_v1, %v504_v31  ;;  %s442_s15 = sadd.s32 %s1988_s14, %s1875_s10 }
  0x1c   : > { %v540_v27 = vmax.f32 %v524_v19, 0.0  ;;  %v577_v29 = vpack.c.bf16 %v538_v23, %v537_v22  ;;  %s427_s21 = scalar_lea.vmem %s2474_s1, %s1610_s17  ;;  %v1952_v49 = vmul.f32 %v1884_v0, %v480_v36  ;;  %v1955_v50 = vadd.f32 %v1896_v1, %v507_v37  ;;  %s1788_s9 = smov 48  }
  0x1d   : > { %v576_v32 = vpack.c.bf16 %v536_v25, %v535_v24  ;;  %v485_v52 = vld [vmem:[%s427_s21] sm:$0xff]  ;;  %v486_v53 = vld [vmem:[%s427_s21 + $0x8] sm:$0xff]  ;;  %s463_s25 = scalar_select %p462_p11, %s1769_s24, 1  ;;  %v541_v58 = vmax.f32 %v525_v43, 0.0  ;;  %v542_v59 = vmax.f32 %v526_v44, 0.0  ;;  %v505_v61 = vmul.f32 %v1884_v0, %v477_v48 }
  0x1e   : > { %v578_v33 = vpack.c.bf16 %v540_v27, %v539_v26  ;;  %v600_v34 = vshrl.u32 %v577_v29, 16  ;;  %v603_v35 = vshll.u32 %v577_v29, 16  ;;  %v551_v2 = vmul.f32 %v1884_v0, %v485_v52  ;;  %s1789_s22 = smov 16   ;;  %v482_v52 = vld [vmem:[%s1891_s18 + $0x68] sm:$0xff]  ;;  %s1791_s17 = smov 64  }
  0x1f   : > { %v593_v38 = vshrl.u32 %v576_v32, 16  ;;  %v596_v39 = vshll.u32 %v576_v32, 16  ;;  %s1976_s8 = sadd.s32 %s1622_s23, %s463_s25  ;;  %v552_v3 = vmul.f32 %v1884_v0, %v486_v53  ;;  %v566_v8 = vstv %s565_s16  ;;  %s1790_s16 = smov 40  }
  0x20   : > { %v607_v40 = vshrl.u32 %v578_v33, 16  ;;  %v610_v41 = vshll.u32 %v578_v33, 16  ;;  %v602_v42 = vrot.slane %v600_v34, 7  ;;  %v506_v9 = vmul.f32 %v1884_v0, %v478_v60  ;;  %s1617_s20 = sshll.u32 %s442_s15, 3  ;;  %s1793_s25 = smov 56  }
  0x21   : > { %v595_v46 = vrot.slane %v593_v38, 7  ;;  %v2012_v17 = vadd.f32 %v1896_v1, %v505_v61  ;;  %v553_v19 = vadd.f32 %v1896_v1, %v551_v2  ;;  %v554_v20 = vadd.f32 %v1896_v1, %v552_v3  ;;  %v481_v38 = vld [vmem:[%s1891_s18 + $0x60] sm:$0xff]  ;;  %s2075_s23 = scalar_lea.vmem %s2475_s2, %s1617_s20  ;;  %s1794_s14 = smov 8  }
  0x22   : > { %v609_v47 = vrot.slane %v607_v40, 7  ;;  %v605_v51 = vor.u32 %v603_v35, %v602_v42  ;;  %v690_v63 = vsel %vm1946_vm2, %v602_v42, 0  ;;  %v579_v21 = vpack.c.bf16 %v542_v59, %v541_v58  ;;  %s2098_s15 = scalar_select %p462_p11, 1, 0 }
  0x23   : > { %v598_v54 = vor.u32 %v596_v39, %v595_v46  ;;  %v1966_v56 = vsel %vm1946_vm2, %v595_v46, 0  ;;  %v819_v11 = vrot.slane %v690_v63, 1  ;;  %v731_v13 = vshll.u32 %v690_v63, 16  ;;  %s1623_s12 = sshll.u32 %s1976_s8, 1 }
  0x24   : > { %v612_v55 = vor.u32 %v610_v41, %v609_v47  ;;  %v1972_v57 = vsel %vm1946_vm2, 0, %v605_v51  ;;  %v816_v6 = vrot.slane %v1966_v56, 1  ;;  %v691_v12 = vsel %vm1946_vm2, %v609_v47, 0  ;;  %s571_s24 = scvt.s32.f32 %s2098_s15 }
  0x25   : > { %904 = vrot.lane.b32.xlu1 %v1972_v57, %s1787_s11  ;;  %v1982_v62 = vsel %vm1946_vm2, 0, %v598_v54  ;;  %v726_v7 = vshll.u32 %v1972_v57, 16  ;;  %v818_v10 = vrot.slane %v1972_v57, 1  ;;  %v724_v14 = vshrl.u32 %v1972_v57, 16 }
  0x26   : > { %902 = vrot.lane.b32.xlu0 %v1982_v62, %s1787_s11  ;;  %v1994_v4 = vsel %vm1946_vm2, 0, %v612_v55  ;;  %v815_v5 = vrot.slane %v1982_v62, 1  ;;  %v822_v23 = vrot.slane %v691_v12, 1  ;;  %v714_v24 = vshll.u32 %v1982_v62, 16 }
  0x27   : > { %v728_v15 = vrot.slane %v726_v7, 1  ;;  %v738_v16 = vshll.u32 %v1994_v4, 16  ;;  %v821_v22 = vrot.slane %v1994_v4, 1  ;;  %v528_v25 = vadd.f32 %v1896_v1, %v506_v9 }
  0x28   : > { %v817_v18 = vsel %vm811_vm3, %v815_v5, %v816_v6  ;;  %v2023_v26 = vsel %vm811_vm3, %v818_v10, %v819_v11  ;;  %v733_v27 = vrot.slane %v731_v13, 1  ;;  %v555_v28 = vmax.f32 %v553_v19, 0.0 }
  0x29   : > { %952 = vrot.lane.b32.xlu1 %v1994_v4, %s1788_s9  ;;  %v556_v29 = vmax.f32 %v554_v20, 0.0  ;;  %v729_v30 = vor.u32 %v728_v15, %v724_v14  ;;  %v736_v31 = vshrl.u32 %v1994_v4, 16  ;;  %v740_v32 = vrot.slane %v738_v16, 1 }
  0x2a   : > { %950 = vrot.lane.b32.xlu0 %v1972_v57, %s1788_s9  ;;  %v743_v33 = vshll.u32 %v691_v12, 16  ;;  %v567_v34 = vmul.f32 %v566_v8, %v555_v28  ;;  %v614_v36 = vshrl.u32 %v579_v21, 16  ;;  %v530_v37 = vadd.f32 %v1896_v1, %v1952_v49 }
  0x2b   : > { %v568_v35 = vmul.f32 %v566_v8, %v556_v29  ;;  %v712_v39 = vshrl.u32 %v1982_v62, 16  ;;  %v716_v40 = vrot.slane %v714_v24, 1  ;;  %v719_v41 = vshll.u32 %v1966_v56, 16  ;;  %v487_v24 = vld [vmem:[%s2075_s23] sm:$0xff] }
  0x2c   : > { %v545_v42 = vmax.f32 %v1955_v50, 0.0  ;;  %v2035_v43 = vsel %vm811_vm3, %v821_v22, %v822_v23  ;;  %v543_v46 = vmax.f32 %v2012_v17, 0.0  ;;  %v546_v47 = vmax.f32 %v530_v37, 0.0  ;;  %v483_v22 = vld [vmem:[%s1891_s18 + $0x70] sm:$0xff]  ;;  %v484_v23 = vld [vmem:[%s1891_s18 + $0x78] sm:$0xff] }
  0x2d   : > { %888 = vrot.lane.b32.xlu1 %v817_v18, %s1789_s22  ;;  %v575_v44 = vpack.c.bf16 %v568_v35, %v567_v34  ;;  %v2041_v48 = vsel %vm698_vm4, %v729_v30, %v733_v27  ;;  %v741_v49 = vor.u32 %v740_v32, %v736_v31  ;;  %v745_v51 = vrot.slane %v743_v33, 1 }
  0x2e   : > { %934 = vrot.lane.b32.xlu0 %v817_v18, %s1790_s16  ;;  %v509_v53 = vmul.f32 %v1884_v0, %v481_v38  ;;  %v616_v55 = vrot.slane %v614_v36, 7  ;;  %v617_v56 = vshll.u32 %v579_v21, 16  ;;  %v717_v58 = vor.u32 %v716_v40, %v712_v39  ;;  %v488_v38 = vld [vmem:[%s2075_s23 + $0x8] sm:$0xff] }
  0x2f   : > { %v586_v50 = vshrl.u32 %v575_v44, 16  ;;  %v589_v54 = vshll.u32 %v575_v44, 16  ;;  %v721_v59 = vrot.slane %v719_v41, 1  ;;  %v544_v60 = vmax.f32 %v528_v25, 0.0 }
  0x30   : > { %v581_v61 = vpack.c.bf16 %v546_v47, %v545_v42  ;;  %v510_v2 = vmul.f32 %v1884_v0, %v482_v52  ;;  %v531_v3 = vadd.f32 %v1896_v1, %v509_v53  ;;  %v2057_v5 = vsel %vm698_vm4, %v741_v49, %v745_v51 }
  0x31   : > { %936 = vrot.lane.b32.xlu1 %v2023_v26, %s1790_s16  ;;  %v588_v63 = vrot.slane %v586_v50, 7  ;;  %v619_v7 = vor.u32 %v617_v56, %v616_v55  ;;  %v722_v9 = vsel %vm698_vm4, %v717_v58, %v721_v59  ;;  %v2062_v10 = vsel %vm1946_vm2, %v616_v55, 0 }
  0x32   : > { %982 = vrot.lane.b32.xlu0 %v2023_v26, %s1791_s17  ;;  %v628_v8 = vshrl.u32 %v581_v61, 16  ;;  %v2064_v11 = vpack.c.bf16 %v544_v60, %v543_v46  ;;  %v755_v16 = vshll.u32 %v2062_v10, 16  ;;  %v631_v20 = vshll.u32 %v581_v61, 16 }
  0x33   : > { %v591_v6 = vor.u32 %v589_v54, %v588_v63  ;;  %v688_v13 = vsel %vm1946_vm2, %v588_v63, 0  ;;  %v2083_v15 = vsel %vm1946_vm2, 0, %v619_v7  ;;  %v532_v21 = vadd.f32 %v1896_v1, %v510_v2 }
  0x34   : > { %v630_v17 = vrot.slane %v628_v8, 7  ;;  %v813_v18 = vrot.slane %v688_v13, 1  ;;  %v621_v19 = vshrl.u32 %v2064_v11, 16  ;;  %v707_v27 = vshll.u32 %v688_v13, 16 }
  0x35   : > { %920 = vrot.lane.b32.xlu1 %v2041_v48, %s1792_s19  ;;  %v2068_v12 = vsel %vm1946_vm2, 0, %v591_v6  ;;  %v547_v29 = vmax.f32 %v531_v3, 0.0  ;;  %v624_v32 = vshll.u32 %v2064_v11, 16  ;;  %v548_v35 = vmax.f32 %v532_v21, 0.0  ;;  %v1742_v11 = vld [vmem:[%s2476_s3 + $0x20] ss:$0 sps:$4 sm:$0xff]  }
  0x36   : > { %984 = vrot.lane.b32.xlu0 %v2035_v43, %s1791_s17  ;;  %v702_v14 = vshll.u32 %v2068_v12, 16  ;;  %v812_v25 = vrot.slane %v2068_v12, 1  ;;  %v2094_v28 = vsel %vm1946_vm2, %v630_v17, 0  ;;  %v700_v30 = vshrl.u32 %v2068_v12, 16  ;;  %1692 = vmatprep.subr.msk.bf16.mxu0 %vm1187_vm5, %v1742_v11 }
  0x37   : > { %v633_v33 = vor.u32 %v631_v20, %v630_v17  ;;  %v831_v34 = vrot.slane %v2094_v28, 1  ;;  %v511_v36 = vmul.f32 %v1884_v0, %v483_v22  ;;  %v512_v37 = vmul.f32 %v1884_v0, %v484_v23  ;;  %1693 = vmatprep.subr.msk.bf16.mxu1 %vm1187_vm5, %v1742_v11 }
  0x38   : > { %v704_v31 = vrot.slane %v702_v14, 1  ;;  %v750_v39 = vshll.u32 %v2083_v15, 16  ;;  %v2110_v40 = vrot.slane %v621_v19, 7  ;;  %v557_v42 = vmul.f32 %v1884_v0, %v487_v24 }
  0x39   : > { %968 = vrot.lane.b32.xlu1 %v2057_v5, %s1793_s25  ;;  %v2114_v41 = vsel %vm1946_vm2, 0, %v633_v33  ;;  %v814_v44 = vsel %vm811_vm3, %v812_v25, %v813_v18  ;;  %v709_v46 = vrot.slane %v707_v27, 1  ;;  %v582_v49 = vpack.c.bf16 %v548_v35, %v547_v29 }
  0x3a   : > { %872 = vrot.lane.b32.xlu0 %v722_v9, %s1794_s14  ;;  %v830_v47 = vrot.slane %v2114_v41, 1  ;;  %v533_v51 = vadd.f32 %v1896_v1, %v511_v36  ;;  %v534_v52 = vadd.f32 %v1896_v1, %v512_v37  ;;  %v558_v53 = vmul.f32 %v1884_v0, %v488_v38 }
  0x3b   : > { %v559_v50 = vadd.f32 %v1896_v1, %v557_v42  ;;  %v705_v54 = vor.u32 %v704_v31, %v700_v30  ;;  %v635_v56 = vshrl.u32 %v582_v49, 16  ;;  %v638_v58 = vshll.u32 %v582_v49, 16 }
  0x3c   : > { %v2129_v55 = vsel %vm811_vm3, %v830_v47, %v831_v34  ;;  %v549_v59 = vmax.f32 %v533_v51, 0.0  ;;  %v550_v60 = vmax.f32 %v534_v52, 0.0  ;;  %v560_v61 = vadd.f32 %v1896_v1, %v558_v53 }
  0x3d   : > { %874 = vrot.lane.b32.xlu1 %v2041_v48, %s1794_s14  ;;  %v561_v63 = vmax.f32 %v559_v50, 0.0  ;;  %v748_v2 = vshrl.u32 %v2083_v15, 16  ;;  %v825_v0 = vrot.slane %v2062_v10, 1  ;;  %v637_v3 = vrot.slane %v635_v56, 7 }
  0x3e   : > { %918 = vrot.lane.b32.xlu0 %v722_v9, %s1792_s19  ;;  %v572_v6 = vstv %s571_s24  ;;  %v757_v7 = vrot.slane %v755_v16, 1  ;;  %v583_v8 = vpack.c.bf16 %v550_v60, %v549_v59  ;;  %v562_v9 = vmax.f32 %v560_v61, 0.0 }
  0x3f   : > { %v626_v1 = vor.u32 %v624_v32, %v2110_v40  ;;  %v640_v13 = vor.u32 %v638_v58, %v637_v3  ;;  %v695_v10 = vsel %vm1946_vm2, %v637_v3, 0  ;;  %v573_v14 = vmul.f32 %v572_v6, %v561_v63 }
  0x40   : > { %v710_v17 = vsel %vm698_vm4, %v705_v54, %v709_v46  ;;  %v791_v18 = vshll.u32 %v695_v10, 16  ;;  %v834_v16 = vrot.slane %v695_v10, 1  ;;  %v642_v19 = vshrl.u32 %v583_v8, 16 }
  0x41   : > { %876 = vrot.lane.b32.xlu1 %v2057_v5, %s1794_s14  ;;  %v2146_v20 = vsel %vm1946_vm2, 0, %v640_v13  ;;  %v645_v21 = vshll.u32 %v583_v8, 16  ;;  %v574_v22 = vmul.f32 %v572_v6, %v562_v9  ;;  %v824_v29 = vrot.slane %v2083_v15, 1 }
  0x42   : > { %966 = vrot.lane.b32.xlu0 %v2041_v48, %s1793_s25  ;;  %v752_v48 = vrot.slane %v750_v39, 1  ;;  %v784_v24 = vshrl.u32 %v2146_v20, 16  ;;  %v786_v25 = vshll.u32 %v2146_v20, 16  ;;  %v833_v27 = vrot.slane %v2146_v20, 1 }
  0x43   : > { %v644_v30 = vrot.slane %v642_v19, 7  ;;  %v584_v31 = vpack.c.bf16 %v574_v22, %v573_v14  ;;  %v1189_v32 = vsel %vm1187_vm5, %v1742_v11, 0  ;;  %v2160_v33 = vsel %vm1946_vm2, 0, %v626_v1 }
  0x44   : > { %v753_v23 = vor.u32 %v752_v48, %v748_v2  ;;  %v788_v34 = vrot.slane %v786_v25, 1  ;;  %v793_v35 = vrot.slane %v791_v18, 1  ;;  %v2163_v36 = vsel %vm811_vm3, %v833_v27, %v834_v16  ;;  %1657 = vmatpush3.bf16.msra.mxu0 %v1189_v32  ;;  %1687 = vmatpush3.bf16.msra.mxu1 %v1189_v32 }
  0x45   : > { %886 = vrot.lane.b32.xlu1 %v814_v44, %s1789_s22  ;;  %v647_v37 = vor.u32 %v645_v21, %v644_v30  ;;  %v696_v38 = vsel %vm1946_vm2, %v644_v30, 0  ;;  %v649_v39 = vshrl.u32 %v584_v31, 16  ;;  %v652_v42 = vshll.u32 %v584_v31, 16  ;;  %v1744_v44 = vld [vmem:[%s2476_s3 + $0x10] sm:$0xff]  }
  0x46   : > { %890 = vrot.lane.b32.xlu0 %v2023_v26, %s1789_s22  ;;  %v1743_v26 = vld [vmem:[%s2476_s3 + $0x18] sm:$0xff]   ;;  %v2173_v46 = vsel %vm698_vm4, %v753_v23, %v757_v7  ;;  %v2178_v47 = vsel %vm1946_vm2, %v2110_v40, 0  ;;  %v789_v49 = vor.u32 %v788_v34, %v784_v24  ;;  %v844_v51 = vshll.u32 %v696_v38, 16 }
  0x47   : > { %1658 = vmatprep.subr.bf16.mxu0 %v1743_v26  ;;  %1683 = vmatprep.subr.bf16.mxu1 %v1743_v26  ;;  %v762_v52 = vshll.u32 %v2160_v33, 16  ;;  %v2185_v53 = vsel %vm1946_vm2, 0, %v647_v37  ;;  %v851_v50 = vrot.slane %v696_v38, 1  ;;  %v651_v54 = vrot.slane %v649_v39, 7 }
  0x48   : > { %v2188_v56 = vsel %vm811_vm3, %v824_v29, %v825_v0  ;;  %v2191_v58 = vsel %vm698_vm4, %v789_v49, %v793_v35  ;;  %v837_v40 = vshrl.u32 %v2185_v53, 16  ;;  %v839_v59 = vshll.u32 %v2185_v53, 16  ;;  %1659 = vmatpush3.bf16.msra.mxu0 %v1743_v26  ;;  %1688 = vmatpush3.bf16.msra.mxu1 %v1743_v26  ;;  %v1745_v0 = vld [vmem:[%s2476_s3 + $0x8] sm:$0xff]  }
  0x49   : > { %892 = vrot.lane.b32.xlu1 %v2035_v43, %s1789_s22  ;;  %v767_v60 = vshll.u32 %v2178_v47, 16  ;;  %v850_v61 = vrot.slane %v2185_v53, 1  ;;  %v654_v63 = vor.u32 %v652_v42, %v651_v54  ;;  %v697_v2 = vsel %vm1946_vm2, %v651_v54, 0  ;;  %1660 = vmatprep.subr.bf16.mxu0 %v1744_v44 }
  0x4a   : > { %870 = vrot.lane.b32.xlu0 %v710_v17, %s1794_s14  ;;  %1684 = vmatprep.subr.bf16.mxu1 %v1744_v44  ;;  %v760_v3 = vshrl.u32 %v2160_v33, 16  ;;  %v841_v6 = vrot.slane %v839_v59, 1  ;;  %v846_v48 = vrot.slane %v844_v51, 1  ;;  %v861_v7 = vshll.u32 %v697_v2, 16 }
  0x4b   : > { %v764_v8 = vrot.slane %v762_v52, 1  ;;  %v2208_v9 = vsel %vm811_vm3, %v850_v61, %v851_v50  ;;  %v2212_v11 = vsel %vm1946_vm2, 0, %v654_v63  ;;  %v868_v1 = vrot.slane %v697_v2, 1 }
  0x4c   : > { %v842_v13 = vor.u32 %v841_v6, %v837_v40  ;;  %v854_v10 = vshrl.u32 %v2212_v11, 16  ;;  %v856_v14 = vshll.u32 %v2212_v11, 16  ;;  %1661 = vmatpush3.bf16.msra.mxu0 %v1744_v44  ;;  %1689 = vmatpush3.bf16.msra.mxu1 %v1744_v44  ;;  %v867_v17 = vrot.slane %v2212_v11, 1 }
  0x4d   : > { %908 = vrot.lane.b32.xlu1 %v2083_v15, %s1787_s11  ;;  %1662 = vmatprep.subr.bf16.mxu0 %v1745_v0  ;;  %v863_v16 = vrot.slane %v861_v7, 1  ;;  %v765_v19 = vor.u32 %v764_v8, %v760_v3  ;;  %v769_v21 = vrot.slane %v767_v60, 1  ;;  %v828_v25 = vrot.slane %v2178_v47, 1 }
  0x4e   : > { %906 = vrot.lane.b32.xlu0 %v1994_v4, %s1787_s11  ;;  %1685 = vmatprep.subr.bf16.mxu1 %v1745_v0  ;;  %v2223_v45 = vsel %vm698_vm4, %v842_v13, %v846_v48  ;;  %v858_v18 = vrot.slane %v856_v14, 1  ;;  %v869_v22 = vsel %vm811_vm3, %v867_v17, %v868_v1  ;;  %v774_v27 = vshll.u32 %v2114_v41, 16 }
  0x4f   : > { %v770_v24 = vsel %vm698_vm4, %v765_v19, %v769_v21  ;;  %v772_v30 = vshrl.u32 %v2114_v41, 16  ;;  %v779_v32 = vshll.u32 %v2094_v28, 16 }
  0x50   : > { %v859_v26 = vor.u32 %v858_v18, %v854_v10  ;;  %1663 = vmatpush3.bf16.msra.mxu0 %v1745_v0  ;;  %1690 = vmatpush3.bf16.msra.mxu1 %v1745_v0  ;;  %v776_v31 = vrot.slane %v774_v27, 1 }
  0x51   : > { %924 = vrot.lane.b32.xlu1 %v2173_v46, %s1792_s19  ;;  %v781_v35 = vrot.slane %v779_v32, 1 }
  0x52   : > { %922 = vrot.lane.b32.xlu0 %v2057_v5, %s1792_s19  ;;  %v1746_v5 = vld [vmem:[%s2476_s3] sm:$0xff]   ;;  %v864_v23 = vsel %vm698_vm4, %v859_v26, %v863_v16  ;;  %v777_v34 = vor.u32 %v776_v31, %v772_v30 }
  0x53   : > { %1664 = vmatprep.subr.bf16.mxu0 %v1746_v5  ;;  %1686 = vmatprep.subr.bf16.mxu1 %v1746_v5 }
  0x54   : > { %1665 = vmatpush3.bf16.msra.mxu0 %v1746_v5  ;;  %1691 = vmatpush3.bf16.msra.mxu1 %v1746_v5  ;;  %v782_v37 = vsel %vm698_vm4, %v777_v34, %v781_v35 }
  0x55   : > { %940 = vrot.lane.b32.xlu1 %v2188_v56, %s1790_s16 }
  0x56   : > { %938 = vrot.lane.b32.xlu0 %v2035_v43, %s1790_s16  ;;  %v827_v43 = vrot.slane %v2160_v33, 1 }
  0x58   : > { %v829_v29 = vsel %vm811_vm3, %v827_v43, %v828_v25 }
  0x59   : > { %956 = vrot.lane.b32.xlu1 %v2160_v33, %s1788_s9 }
  0x5a   : > { %954 = vrot.lane.b32.xlu0 %v2083_v15, %s1788_s9 }
  0x5d   : > { %972 = vrot.lane.b32.xlu1 %v770_v24, %s1793_s25 }
  0x5e   : > { %970 = vrot.lane.b32.xlu0 %v2173_v46, %s1793_s25 }
  0x61   : > { %878 = vrot.lane.b32.xlu1 %v2173_v46, %s1794_s14 }
  0x62   : > { %986 = vrot.lane.b32.xlu0 %v2188_v56, %s1791_s17 }
  0x65   : > { %880 = vrot.lane.b32.xlu1 %v770_v24, %s1794_s14 }
  0x66   : > { %988 = vrot.lane.b32.xlu0 %v829_v29, %s1791_s17 }
  0x69   : > { %896 = vrot.lane.b32.xlu1 %v829_v29, %s1789_s22 }
  0x6a   : > { %894 = vrot.lane.b32.xlu0 %v2188_v56, %s1789_s22 }
  0x6d   : > { %912 = vrot.lane.b32.xlu1 %v2114_v41, %s1787_s11 }
  0x6e   : > { %910 = vrot.lane.b32.xlu0 %v2160_v33, %s1787_s11 }
  0x71   : > { %928 = vrot.lane.b32.xlu1 %v782_v37, %s1792_s19 }
  0x72   : > { %926 = vrot.lane.b32.xlu0 %v770_v24, %s1792_s19 }
  0x75   : > { %944 = vrot.lane.b32.xlu1 %v2129_v55, %s1790_s16 }
  0x76   : > { %942 = vrot.lane.b32.xlu0 %v829_v29, %s1790_s16 }
  0x79   : > { %960 = vrot.lane.b32.xlu1 %v2146_v20, %s1788_s9 }
  0x7a   : > { %958 = vrot.lane.b32.xlu0 %v2114_v41, %s1788_s9 }
  0x7d   : > { %976 = vrot.lane.b32.xlu1 %v2191_v58, %s1793_s25 }
  0x7e   : > { %974 = vrot.lane.b32.xlu0 %v782_v37, %s1793_s25 }
  0x81   : > { %882 = vrot.lane.b32.xlu1 %v782_v37, %s1794_s14 }
  0x82   : > { %990 = vrot.lane.b32.xlu0 %v2129_v55, %s1791_s17 }
  0x85   : > { %884 = vrot.lane.b32.xlu1 %v2191_v58, %s1794_s14 }
  0x86   : > { %992 = vrot.lane.b32.xlu0 %v2163_v36, %s1791_s17 }
  0x89   : > { %900 = vrot.lane.b32.xlu1 %v2163_v36, %s1789_s22 }
  0x8a   : > { %898 = vrot.lane.b32.xlu0 %v2129_v55, %s1789_s22  ;;  %s2387_s22 = scalar_lea.vmem %s2479_s6, %s1600_s13 }
  0x8d   : > { %916 = vrot.lane.b32.xlu1 %v2185_v53, %s1787_s11 }
  0x8e   : > { %914 = vrot.lane.b32.xlu0 %v2146_v20, %s1787_s11 }
  0x91   : > { %932 = vrot.lane.b32.xlu1 %v2223_v45, %s1792_s19 }
  0x92   : > { %930 = vrot.lane.b32.xlu0 %v2191_v58, %s1792_s19 }
  0x95   : > { %948 = vrot.lane.b32.xlu1 %v2208_v9, %s1790_s16 }
  0x96   : > { %946 = vrot.lane.b32.xlu0 %v2163_v36, %s1790_s16 }
  0x97   : > { %v905_v28 = vpop.permute.xlu1 %904 }
  0x98   : > { %v903_v55 = vpop.permute.xlu0 %902 }
  0x99   : > { %964 = vrot.lane.b32.xlu1 %v2212_v11, %s1788_s9 }
  0x9a   : > { %962 = vrot.lane.b32.xlu0 %v2185_v53, %s1788_s9 }
  0x9b   : > { %v953_v38 = vpop.permute.xlu1 %952 }
  0x9c   : > { %v951_v39 = vpop.permute.xlu0 %950 }
  0x9d   : > { %980 = vrot.lane.b32.xlu1 %v864_v23, %s1793_s25 }
  0x9e   : > { %978 = vrot.lane.b32.xlu0 %v2223_v45, %s1793_s25 }
  0x9f   : > { %v889_v42 = vpop.permute.xlu1 %888 }
  0xa0   : > { %v935_v44 = vpop.permute.xlu0 %934 }
  0xa1   : > { %996 = vrot.lane.b32.xlu1 %v869_v22, %s1791_s17 }
  0xa2   : > { %994 = vrot.lane.b32.xlu0 %v2208_v9, %s1791_s17  ;;  %s467_s17 = scalar_lea.vmem %s2480_s7, %s1623_s12 }
  0xa3   : > { %v937_v36 = vpop.permute.xlu1 %936 }
  0xa4   : > { %v983_v46 = vpop.permute.xlu0 %982 }
  0xa7   : > { %v921_v47 = vpop.permute.xlu1 %920 }
  0xa8   : > { %v985_v49 = vpop.permute.xlu0 %984 }
  0xab   : > { %v969_v51 = vpop.permute.xlu1 %968 }
  0xac   : > { %v873_v52 = vpop.permute.xlu0 %872 }
  0xad   : > { %v1002_v50 = vsel %vm998_vm6, %v1982_v62, %v873_v52 }
  0xae   : > { %v1019_v56 = vsel %vm1015_vm7, %v1002_v50, %v889_v42 }
  0xaf   : > { %v875_v53 = vpop.permute.xlu1 %874  ;;  %v1036_v59 = vsel %vm1032_vm8, %v1019_v56, %v905_v28 }
  0xb0   : > { %v919_v54 = vpop.permute.xlu0 %918  ;;  %v1053_v63 = vsel %vm1049_vm9, %v1036_v59, %v921_v47  ;;  %v1004_v22 = vsel %vm998_vm6, %v1972_v57, %v875_v53 }
  0xb1   : > { %v1070_v3 = vsel %vm1066_vm10, %v1053_v63, %v937_v36 }
  0xb2   : > { %v1087_v8 = vsel %vm1083_vm11, %v1070_v3, %v953_v38 }
  0xb3   : > { %v877_v58 = vpop.permute.xlu1 %876  ;;  %v1104_v10 = vsel %vm1100_vm12, %v1087_v8, %v969_v51 }
  0xb4   : > { %v967_v40 = vpop.permute.xlu0 %966  ;;  %v1121_v45 = vsel %vm1117_vm13, %v1104_v10, %v985_v49  ;;  %v1006_v27 = vsel %vm998_vm6, %v1994_v4, %v877_v58 }
  0xb7   : > { %v887_v60 = vpop.permute.xlu1 %886 }
  0xb8   : > { %v891_v61 = vpop.permute.xlu0 %890 }
  0xb9   : > { %v1021_v26 = vsel %vm1015_vm7, %v1004_v22, %v891_v61 }
  0xbb   : > { %v893_v2 = vpop.permute.xlu1 %892 }
  0xbc   : > { %v871_v0 = vpop.permute.xlu0 %870  ;;  %v1023_v30 = vsel %vm1015_vm7, %v1006_v27, %v893_v2 }
  0xbd   : > { %v1000_v62 = vsel %vm998_vm6, %v2068_v12, %v871_v0 }
  0xbe   : > { %v1017_v6 = vsel %vm1015_vm7, %v1000_v62, %v887_v60 }
  0xbf   : > { %v1034_v48 = vsel %vm1032_vm8, %v1017_v6, %v903_v55  ;;  %v909_v7 = vpop.permute.xlu1 %908 }
  0xc0   : > { %v1051_v9 = vsel %vm1049_vm9, %v1034_v48, %v919_v54  ;;  %v907_v11 = vpop.permute.xlu0 %906  ;;  %v1040_v57 = vsel %vm1032_vm8, %v1023_v30, %v909_v7 }
  0xc1   : > { %v1068_v1 = vsel %vm1066_vm10, %v1051_v9, %v935_v44  ;;  %v1038_v24 = vsel %vm1032_vm8, %v1021_v26, %v907_v11 }
  0xc2   : > { %v1085_v13 = vsel %vm1083_vm11, %v1068_v1, %v951_v39 }
  0xc3   : > { %v925_v12 = vpop.permute.xlu1 %924  ;;  %v1102_v14 = vsel %vm1100_vm12, %v1085_v13, %v967_v40 }
  0xc4   : > { %v923_v17 = vpop.permute.xlu0 %922  ;;  %v1119_v5 = vsel %vm1117_vm13, %v1102_v14, %v983_v46  ;;  %v1057_v37 = vsel %vm1049_vm9, %v1040_v57, %v925_v12 }
  0xc5   : > { %1666 = vmatprep.mubr.msk.bf16.mxu0 %vm1170_vm14, %v1119_v5  ;;  %v1055_v25 = vsel %vm1049_vm9, %v1038_v24, %v923_v17 }
  0xc6   : > { %1667 = vmatmul.mubr.msk.bf16.vlgmr.msra.gmra.mxu0 %vm1170_vm14, %v1121_v45 }
  0xc7   : > { %v941_v18 = vpop.permute.xlu1 %940 }
  0xc8   : > { %v939_v16 = vpop.permute.xlu0 %938  ;;  %v1074_v55 = vsel %vm1066_vm10, %v1057_v37, %v941_v18 }
  0xc9   : > { %v1072_v29 = vsel %vm1066_vm10, %v1055_v25, %v939_v16 }
  0xcb   : > { %v957_v19 = vpop.permute.xlu1 %956 }
  0xcc   : > { %v955_v21 = vpop.permute.xlu0 %954  ;;  %v1091_v4 = vsel %vm1083_vm11, %v1074_v55, %v957_v19 }
  0xcd   : > { %v1089_v31 = vsel %vm1083_vm11, %v1072_v29, %v955_v21 }
  0xcf   : > { %v973_v23 = vpop.permute.xlu1 %972 }
  0xd0   : > { %v971_v43 = vpop.permute.xlu0 %970  ;;  %v1108_v39 = vsel %vm1100_vm12, %v1091_v4, %v973_v23 }
  0xd1   : > { %v1106_v34 = vsel %vm1100_vm12, %v1089_v31, %v971_v43 }
  0xd3   : > { %v879_v32 = vpop.permute.xlu1 %878 }
  0xd4   : > { %v987_v35 = vpop.permute.xlu0 %986  ;;  %v1008_v58 = vsel %vm998_vm6, %v2083_v15, %v879_v32 }
  0xd5   : > { %v1123_v28 = vsel %vm1117_vm13, %v1106_v34, %v987_v35 }
  0xd6   : > { %1670 = vmatprep.mubr.msk.bf16.mxu0 %vm1170_vm14, %v1123_v28 }
  0xd7   : > { %v881_v38 = vpop.permute.xlu1 %880 }
  0xd8   : > { %v989_v42 = vpop.permute.xlu0 %988  ;;  %v1010_v2 = vsel %vm998_vm6, %v2160_v33, %v881_v38 }
  0xd9   : > { %v1125_v44 = vsel %vm1117_vm13, %v1108_v39, %v989_v42 }
  0xda   : > { %1671 = vmatmul.mubr.msk.bf16.gmra.mxu0 %vm1170_vm14, %v1125_v44 }
  0xdb   : > { %v897_v36 = vpop.permute.xlu1 %896 }
  0xdc   : > { %v895_v46 = vpop.permute.xlu0 %894  ;;  %v1027_v3 = vsel %vm1015_vm7, %v1010_v2, %v897_v36 }
  0xdd   : > { %v1025_v40 = vsel %vm1015_vm7, %v1008_v58, %v895_v46 }
  0xdf   : > { %v913_v47 = vpop.permute.xlu1 %912 }
  0xe0   : > { %v911_v49 = vpop.permute.xlu0 %910  ;;  %v1044_v15 = vsel %vm1032_vm8, %v1027_v3, %v913_v47 }
  0xe1   : > { %v1042_v60 = vsel %vm1032_vm8, %v1025_v40, %v911_v49 }
  0xe3   : > { %v929_v51 = vpop.permute.xlu1 %928 }
  0xe4   : > { %v927_v52 = vpop.permute.xlu0 %926  ;;  %v1061_v8 = vsel %vm1049_vm9, %v1044_v15, %v929_v51 }
  0xe5   : > { %v1059_v63 = vsel %vm1049_vm9, %v1042_v60, %v927_v52 }
  0xe7   : > { %v945_v53 = vpop.permute.xlu1 %944 }
  0xe8   : > { %v943_v50 = vpop.permute.xlu0 %942  ;;  %v1078_v11 = vsel %vm1066_vm10, %v1061_v8, %v945_v53 }
  0xe9   : > { %v1076_v0 = vsel %vm1066_vm10, %v1059_v63, %v943_v50 }
  0xeb   : > { %v961_v54 = vpop.permute.xlu1 %960 }
  0xec   : > { %v959_v56 = vpop.permute.xlu0 %958  ;;  %v1095_v33 = vsel %vm1083_vm11, %v1078_v11, %v961_v54 }
  0xed   : > { %v1093_v62 = vsel %vm1083_vm11, %v1076_v0, %v959_v56 }
  0xef   : > { %v977_v59 = vpop.permute.xlu1 %976 }
  0xf0   : > { %v975_v61 = vpop.permute.xlu0 %974  ;;  %v1112_v13 = vsel %vm1100_vm12, %v1095_v33, %v977_v59 }
  0xf1   : > { %v1110_v48 = vsel %vm1100_vm12, %v1093_v62, %v975_v61 }
  0xf3   : > { %v883_v6 = vpop.permute.xlu1 %882 }
  0xf4   : > { %v991_v7 = vpop.permute.xlu0 %990  ;;  %v1012_v24 = vsel %vm998_vm6, %v2114_v41, %v883_v6 }
  0xf5   : > { %v1127_v9 = vsel %vm1117_vm13, %v1110_v48, %v991_v7 }
  0xf6   : > { %1674 = vmatprep.mubr.msk.bf16.mxu1 %vm1170_vm14, %v1127_v9 }
  0xf7   : > { %v885_v1 = vpop.permute.xlu1 %884 }
  0xf8   : > { %v993_v10 = vpop.permute.xlu0 %992  ;;  %v1014_v23 = vsel %vm998_vm6, %v2146_v20, %v885_v1 }
  0xf9   : > { %v1129_v12 = vsel %vm1117_vm13, %v1112_v13, %v993_v10 }
  0xfa   : > { %1675 = vmatmul.mubr.msk.bf16.vlgmr.msra.gmra.mxu1 %vm1170_vm14, %v1129_v12 }
  0xfb   : > { %v901_v14 = vpop.permute.xlu1 %900 }
  0xfc   : > { %v899_v17 = vpop.permute.xlu0 %898  ;;  %v1031_v43 = vsel %vm1015_vm7, %v1014_v23, %v901_v14 }
  0xfd   : > { %v1029_v25 = vsel %vm1015_vm7, %v1012_v24, %v899_v17 }
  0xff   : > { %v917_v5 = vpop.permute.xlu1 %916 }
 0x100   : > { %v915_v45 = vpop.permute.xlu0 %914  ;;  %v1048_v27 = vsel %vm1032_vm8, %v1031_v43, %v917_v5 }
 0x101   : > { %v1046_v30 = vsel %vm1032_vm8, %v1029_v25, %v915_v45 }
 0x103   : > { %v933_v18 = vpop.permute.xlu1 %932 }
 0x104   : > { %v931_v16 = vpop.permute.xlu0 %930  ;;  %v1065_v31 = vsel %vm1049_vm9, %v1048_v27, %v933_v18 }
 0x105   : > { %v1063_v57 = vsel %vm1049_vm9, %v1046_v30, %v931_v16 }
 0x107   : > { %v949_v19 = vpop.permute.xlu1 %948 }
 0x108   : > { %v947_v21 = vpop.permute.xlu0 %946  ;;  %v1082_v20 = vsel %vm1066_vm10, %v1065_v31, %v949_v19 }
 0x109   : > { %v1080_v34 = vsel %vm1066_vm10, %v1063_v57, %v947_v21 }
 0x10b   : > { %v965_v22 = vpop.permute.xlu1 %964 }
 0x10c   : > { %v963_v26 = vpop.permute.xlu0 %962  ;;  %v1099_v41 = vsel %vm1083_vm11, %v1082_v20, %v965_v22 }
 0x10d   : > { %v1097_v35 = vsel %vm1083_vm11, %v1080_v34, %v963_v26 }
 0x10f   : > { %v981_v29 = vpop.permute.xlu1 %980 }
 0x110   : > { %v979_v32 = vpop.permute.xlu0 %978  ;;  %v1116_v37 = vsel %vm1100_vm12, %v1099_v41, %v981_v29 }
 0x111   : > { %v1114_v55 = vsel %vm1100_vm12, %v1097_v35, %v979_v32 }
 0x113   : > { %v997_v28 = vpop.permute.xlu1 %996 }
 0x114   : > { %v1133_v4 = vsel %vm1117_vm13, %v1116_v37, %v997_v28  ;;  %v995_v38 = vpop.permute.xlu0 %994 }
 0x115   : > { %v1131_v39 = vsel %vm1117_vm13, %v1114_v55, %v995_v38 }
 0x116   : > { %1678 = vmatprep.mubr.msk.bf16.mxu1 %vm1170_vm14, %v1131_v39 }
 0x117   : > { %1679 = vmatmul.mubr.msk.bf16.gmra.mxu1 %vm1170_vm14, %v1133_v4 }
 0x186   : > { %v1668_v42 = vpop.f32.mrf.mxu0 }
 0x187   : > { %1290 = vst.msk [vmem:[%s2387_s22 + $0x10] sm:$0xff] %vm998_vm6, %v1668_v42  ;;  %v1307_v52 = vsel %vm998_vm6, %v1668_v42, 0.0  ;;  %v1343_v0 = vmul.f32 %v1668_v42, %v1668_v42 }
 0x188   : > { %v1225_v44 = vpop.f32.mrf.mxu0 }
 0x189   : > { %1288 = vst.msk [vmem:[%s2387_s22] sm:$0xff] %vm998_vm6, %v1225_v44  ;;  %v1304_v47 = vsel %vm998_vm6, %v1225_v44, 0.0  ;;  %v1341_v61 = vmul.f32 %v1225_v44, %v1225_v44  ;;  %v1360_v48 = vsel %vm998_vm6, %v1343_v0, 0.0 }
 0x18a   : > { %v1669_v36 = vpop.f32.mrf.mxu0 }
 0x18b   : > { %1291 = vst.msk [vmem:[%s2387_s22 + $0x18] sm:$0xff] %vm998_vm6, %v1669_v36  ;;  %v1309_v50 = vsel %vm998_vm6, %v1669_v36, 0.0  ;;  %v1357_v3 = vsel %vm998_vm6, %v1341_v61, 0.0  ;;  %v1344_v7 = vmul.f32 %v1669_v36, %v1669_v36 }
 0x18c   : > { %v1228_v46 = vpop.f32.mrf.mxu0 }
 0x18d   : > { %1289 = vst.msk [vmem:[%s2387_s22 + $0x8] sm:$0xff] %vm998_vm6, %v1228_v46  ;;  %v1305_v49 = vsel %vm998_vm6, %v1228_v46, 0.0  ;;  %v1342_v60 = vmul.f32 %v1228_v46, %v1228_v46  ;;  %v1362_v13 = vsel %vm998_vm6, %v1344_v7, 0.0 }
 0x18e   : > { %v1306_v51 = vadd.f32 %v1305_v49, %v1304_v47 }
 0x18f   : > { %v1358_v63 = vsel %vm998_vm6, %v1342_v60, 0.0 }
 0x190   : > { %v1308_v53 = vadd.f32 %v1307_v52, %v1306_v51  ;;  %v1359_v6 = vadd.f32 %v1358_v63, %v1357_v3 }
 0x192   : > { %v1310_v54 = vadd.f32 %v1309_v50, %v1308_v53  ;;  %v1361_v11 = vadd.f32 %v1360_v48, %v1359_v6 }
 0x194   : > { %v1363_v17 = vadd.f32 %v1362_v13, %v1361_v11 }
 0x19a   : > { %v1672_v56 = vpop.f32.mrf.mxu0 }
 0x19b   : > { %1294 = vst.msk [vmem:[%s2387_s22 + $0x30] sm:$0xff] %vm998_vm6, %v1672_v56  ;;  %v1347_v16 = vmul.f32 %v1672_v56, %v1672_v56  ;;  %v1315_v21 = vsel %vm998_vm6, %v1672_v56, 0.0 }
 0x19c   : > { %v1241_v58 = vpop.f32.mrf.mxu0 }
 0x19d   : > { %1292 = vst.msk [vmem:[%s2387_s22 + $0x20] sm:$0xff] %vm998_vm6, %v1241_v58  ;;  %v1345_v8 = vmul.f32 %v1241_v58, %v1241_v58  ;;  %v1311_v33 = vsel %vm998_vm6, %v1241_v58, 0.0  ;;  %v1368_v26 = vsel %vm998_vm6, %v1347_v16, 0.0 }
 0x19e   : > { %v1673_v40 = vpop.f32.mrf.mxu0  ;;  %v1312_v14 = vadd.f32 %v1311_v33, %v1310_v54 }
 0x19f   : > { %1295 = vst.msk [vmem:[%s2387_s22 + $0x38] sm:$0xff] %vm998_vm6, %v1673_v40  ;;  %v1364_v10 = vsel %vm998_vm6, %v1345_v8, 0.0  ;;  %v1348_v23 = vmul.f32 %v1673_v40, %v1673_v40  ;;  %v1317_v25 = vsel %vm998_vm6, %v1673_v40, 0.0 }
 0x1a0   : > { %v1244_v59 = vpop.f32.mrf.mxu0  ;;  %v1365_v45 = vadd.f32 %v1364_v10, %v1363_v17 }
 0x1a1   : > { %1293 = vst.msk [vmem:[%s2387_s22 + $0x28] sm:$0xff] %vm998_vm6, %v1244_v59  ;;  %v1346_v1 = vmul.f32 %v1244_v59, %v1244_v59  ;;  %v1313_v12 = vsel %vm998_vm6, %v1244_v59, 0.0  ;;  %v1370_v31 = vsel %vm998_vm6, %v1348_v23, 0.0 }
 0x1a2   : > { %v1314_v18 = vadd.f32 %v1313_v12, %v1312_v14 }
 0x1a3   : > { %v1366_v5 = vsel %vm998_vm6, %v1346_v1, 0.0 }
 0x1a4   : > { %v1367_v19 = vadd.f32 %v1366_v5, %v1365_v45  ;;  %v1316_v22 = vadd.f32 %v1315_v21, %v1314_v18 }
 0x1a6   : > { %v1369_v43 = vadd.f32 %v1368_v26, %v1367_v19  ;;  %v1318_v30 = vadd.f32 %v1317_v25, %v1316_v22 }
 0x1a8   : > { %v1371_v34 = vadd.f32 %v1370_v31, %v1369_v43 }
 0x1ba   : > { %v1676_v2 = vpop.f32.mrf.mxu1 }
 0x1bb   : > { %1298 = vst.msk [vmem:[%s2387_s22 + $0x50] sm:$0xff] %vm998_vm6, %v1676_v2  ;;  %v1351_v28 = vmul.f32 %v1676_v2, %v1676_v2  ;;  %v1323_v4 = vsel %vm998_vm6, %v1676_v2, 0.0 }
 0x1bc   : > { %v1257_v62 = vpop.f32.mrf.mxu1 }
 0x1bd   : > { %1296 = vst.msk [vmem:[%s2387_s22 + $0x40] sm:$0xff] %vm998_vm6, %v1257_v62  ;;  %v1349_v24 = vmul.f32 %v1257_v62, %v1257_v62  ;;  %v1319_v27 = vsel %vm998_vm6, %v1257_v62, 0.0  ;;  %v1376_v42 = vsel %vm998_vm6, %v1351_v28, 0.0 }
 0x1be   : > { %v1677_v15 = vpop.f32.mrf.mxu1  ;;  %v1320_v20 = vadd.f32 %v1319_v27, %v1318_v30 }
 0x1bf   : > { %1299 = vst.msk [vmem:[%s2387_s22 + $0x58] sm:$0xff] %vm998_vm6, %v1677_v15  ;;  %v1372_v32 = vsel %vm998_vm6, %v1349_v24, 0.0  ;;  %v1352_v44 = vmul.f32 %v1677_v15, %v1677_v15  ;;  %v1325_v47 = vsel %vm998_vm6, %v1677_v15, 0.0 }
 0x1c0   : > { %v1260_v9 = vpop.f32.mrf.mxu1  ;;  %v1373_v35 = vadd.f32 %v1372_v32, %v1371_v34 }
 0x1c1   : > { %1297 = vst.msk [vmem:[%s2387_s22 + $0x48] sm:$0xff] %vm998_vm6, %v1260_v9  ;;  %v1350_v29 = vmul.f32 %v1260_v9, %v1260_v9  ;;  %v1321_v57 = vsel %vm998_vm6, %v1260_v9, 0.0  ;;  %v1378_v50 = vsel %vm998_vm6, %v1352_v44, 0.0 }
 0x1c2   : > { %v1322_v37 = vadd.f32 %v1321_v57, %v1320_v20 }
 0x1c3   : > { %v1374_v41 = vsel %vm998_vm6, %v1350_v29, 0.0 }
 0x1c4   : > { %v1375_v55 = vadd.f32 %v1374_v41, %v1373_v35  ;;  %v1324_v38 = vadd.f32 %v1323_v4, %v1322_v37 }
 0x1c6   : > { %v1377_v36 = vadd.f32 %v1376_v42, %v1375_v55  ;;  %v1326_v52 = vadd.f32 %v1325_v47, %v1324_v38 }
 0x1c8   : > { %v1379_v58 = vadd.f32 %v1378_v50, %v1377_v36 }
 0x1d7   : > { %v1680_v39 = vpop.f32.mrf.mxu1 }
 0x1d8   : > { %1302 = vst.msk [vmem:[%s2387_s22 + $0x70] sm:$0xff] %vm998_vm6, %v1680_v39  ;;  %v1355_v59 = vmul.f32 %v1680_v39, %v1680_v39  ;;  %v1331_v0 = vsel %vm998_vm6, %v1680_v39, 0.0 }
 0x1d9   : > { %v1273_v46 = vpop.f32.mrf.mxu1 }
 0x1da   : > { %1300 = vst.msk [vmem:[%s2387_s22 + $0x60] sm:$0xff] %vm998_vm6, %v1273_v46  ;;  %v1327_v49 = vsel %vm998_vm6, %v1273_v46, 0.0  ;;  %v1353_v51 = vmul.f32 %v1273_v46, %v1273_v46  ;;  %v1384_v48 = vsel %vm998_vm6, %v1355_v59, 0.0 }
 0x1db   : > { %v1681_v53 = vpop.f32.mrf.mxu1  ;;  %v1328_v56 = vadd.f32 %v1327_v49, %v1326_v52 }
 0x1dc   : > { %v1380_v54 = vsel %vm998_vm6, %v1353_v51, 0.0  ;;  %1303 = vst.msk [vmem:[%s2387_s22 + $0x78] sm:$0xff] %vm998_vm6, %v1681_v53  ;;  %v1356_v3 = vmul.f32 %v1681_v53, %v1681_v53  ;;  %v1333_v7 = vsel %vm998_vm6, %v1681_v53, 0.0 }
 0x1dd   : > { %v1276_v40 = vpop.f32.mrf.mxu1  ;;  %v1381_v63 = vadd.f32 %v1380_v54, %v1379_v58 }
 0x1de   : > { %1301 = vst.msk [vmem:[%s2387_s22 + $0x68] sm:$0xff] %vm998_vm6, %v1276_v40  ;;  %v1329_v60 = vsel %vm998_vm6, %v1276_v40, 0.0  ;;  %v1354_v61 = vmul.f32 %v1276_v40, %v1276_v40  ;;  %v1386_v11 = vsel %vm998_vm6, %v1356_v3, 0.0 }
 0x1df   : > { %v1330_v2 = vadd.f32 %v1329_v60, %v1328_v56 }
 0x1e0   : > { %v1382_v62 = vsel %vm998_vm6, %v1354_v61, 0.0 }
 0x1e1   : > { %v1332_v6 = vadd.f32 %v1331_v0, %v1330_v2  ;;  %v1383_v15 = vadd.f32 %v1382_v62, %v1381_v63 }
 0x1e3   : > { %v1334_v8 = vadd.f32 %v1333_v7, %v1332_v6  ;;  %v1385_v9 = vadd.f32 %v1384_v48, %v1383_v15 }
 0x1e5   : > { %v1335_v33 = vrot.slane %v1334_v8, 4  ;;  %v1387_v1 = vadd.f32 %v1386_v11, %v1385_v9 }
 0x1e7   : > { %v1336_v13 = vadd.f32 %v1335_v33, %v1334_v8  ;;  %v1388_v10 = vrot.slane %v1387_v1, 4 }
 0x1e9   : > { %v1337_v12 = vrot.slane %v1336_v13, 2  ;;  %v1389_v14 = vadd.f32 %v1388_v10, %v1387_v1 }
 0x1eb   : > { %v1338_v17 = vadd.f32 %v1337_v12, %v1336_v13  ;;  %v1390_v5 = vrot.slane %v1389_v14, 2 }
 0x1ed   : > { %v1339_v45 = vrot.slane %v1338_v17, 1  ;;  %v1391_v18 = vadd.f32 %v1390_v5, %v1389_v14 }
 0x1ef   : > { %v1392_v16 = vrot.slane %v1391_v18, 1  ;;  %v1340_v19 = vadd.f32 %v1339_v45, %v1338_v17 }
 0x1f1   : > { %v1393_v21 = vadd.f32 %v1392_v16, %v1391_v18 }
 0x1f3   : > { %v1395_v22 = vsel %vm675_vm0, %v1340_v19, %v1393_v21 }
 0x1f4   : > { %1397 = vst.msk [vmem:[%s467_s17] sm:$0x3] %vm1396_vm15, %v1395_v22 }
 0x1f5 PF: > { %s18_s28 = sadd.s32 1, %s1785_s28   ;;  %s2484_s24 = smov %s1777_s26 }
 0x1f6   : > { %p15_p12 = scmp.ge.s32.totalorder %s18_s28, 6   ;;  %s2485_s25 = smov %s1781_s27 }
 0x1f7   : > { %s2486_s26 = smov %s2489_s29  ;;  %s2487_s27 = smov %s2493_s30 }
 0x1f8   :  { %17 = sbr.rel (!%p15_p12) target bundleno = 3 (0x3), region = 92 }

</bundles_post_ra>
